<compile_context>
chip_gen: v7x
topology: tpu7x:2x2x1
jax: 0.10.0
libtpu: 0.0.40
codegen_flags: <defaults>
</compile_context>

<pallas_src>
import jax
import jax.numpy as jnp
from jax import lax
from jax.experimental import pallas as pl
from jax.experimental.pallas import tpu as pltpu

_VMEM_LIMIT = 32 * 1024 * 1024   # safe on v5e/v6e/v7x (raises v5e's 16 MiB default)


# ---------------------------------------------------------------------------
# Kernel 1: encoder stub -- tiled matmul  h = x @ w   (bf16 MXU in, f32 out)
# ---------------------------------------------------------------------------
def _matmul_kernel(x_ref, w_ref, o_ref, acc_ref):
    @pl.when(pl.program_id(2) == 0)
    def _init():
        acc_ref[...] = jnp.zeros_like(acc_ref)

    acc_ref[...] += jnp.dot(x_ref[...], w_ref[...],
                            preferred_element_type=jnp.float32)

    @pl.when(pl.program_id(2) == pl.num_programs(2) - 1)
    def _store():
        o_ref[...] = acc_ref[...].astype(o_ref.dtype)


def _pick_tile(dim, candidates):
    for c in candidates:
        if dim % c == 0:
            return c
    return dim   # full extent is always a legal block size


def _encoder_matmul(x2d, w):
    """x2d: (M, Din) bf16, w: (Din, D) bf16 -> (M, D) f32."""
    M, Din = x2d.shape
    D = w.shape[1]

    tm = _pick_tile(M, (512, 256, 128))    # MXU-sized M tiles over flattened B*L
    tn = _pick_tile(D, (256, 128))         # lane-dense output tiles
    tk = _pick_tile(Din, (512, 256, 128))

    grid = (M // tm, D // tn, Din // tk)

    return pl.pallas_call(
        _matmul_kernel,
        out_shape=jax.ShapeDtypeStruct((M, D), jnp.float32),
        grid_spec=pltpu.PrefetchScalarGridSpec(
            num_scalar_prefetch=0,
            grid=grid,
            in_specs=[
                pl.BlockSpec((tm, tk), lambda i, j, k: (i, k)),
                # weight tile is bf16 and only changes when (k, j) changes, so
                # the default double-buffer overhead is small after tiling
                pl.BlockSpec((tk, tn), lambda i, j, k: (k, j)),
            ],
            out_specs=pl.BlockSpec((tm, tn), lambda i, j, k: (i, j)),
            scratch_shapes=[pltpu.VMEM((tm, tn), jnp.float32)],
        ),
        compiler_params=pltpu.CompilerParams(
            dimension_semantics=("parallel", "parallel", "arbitrary"),
            vmem_limit_bytes=_VMEM_LIMIT),
    )(x2d, w)


# ---------------------------------------------------------------------------
# Kernel 2: per-batch L2 norm + length-masked softmax + rescale
# ---------------------------------------------------------------------------
def _softmax_rescale_kernel(lens_ref, h_ref, out_ref):
    b = pl.program_id(0)
    length = lens_ref[b]

    h = h_ref[0]                                              # (L, D) f32
    # norm = torch.norm(pro_feat, dim=2)
    sq = jnp.sum(h * h, axis=-1, keepdims=True)               # (L, 1)
    norm = jnp.sqrt(sq)

    # mask positions >= proteins_num[b] with -1e10 (as in masked_fill)
    pos = lax.broadcasted_iota(jnp.int32, norm.shape, 0)      # (L, 1)
    masked = jnp.where(pos < length, norm, jnp.float32(-1e10))

    # softmax over the sequence dim (dim=1 in PyTorch), fused single pass
    m = jnp.max(masked, axis=0, keepdims=True)
    p = jnp.exp(masked - m)
    s = jnp.sum(p, axis=0, keepdims=True)
    attn = p * pl.reciprocal(s, approx=True)                  # EUP divide (free slot)

    # pro_feat * norm.unsqueeze(-1); re-read h from VMEM to keep vreg pressure low
    out_ref[0] = (h_ref[0] * attn).astype(out_ref.dtype)


def prottrans_forward(seq_emb, proteins_num, w_enc):
    """seq_emb: (B, L, Din) f32; proteins_num: (B,) int32; w_enc: (Din, D) f32."""
    B, L, Din = seq_emb.shape
    D = w_enc.shape[1]

    # Feed the MXU in bf16 (halves DMA bytes, ~4x MXU throughput on v6e/v7x);
    # accumulation stays f32 inside the kernel.
    x2d = seq_emb.reshape(B * L, Din).astype(jnp.bfloat16)
    w_bf = w_enc.astype(jnp.bfloat16)

    h = _encoder_matmul(x2d, w_bf).reshape(B, L, D)           # (B, L, D) f32

    grid_spec = pltpu.PrefetchScalarGridSpec(
        num_scalar_prefetch=1,
        grid=(B,),
        in_specs=[pl.BlockSpec((1, L, D), lambda b, lens: (b, 0, 0))],
        out_specs=pl.BlockSpec((1, L, D), lambda b, lens: (b, 0, 0)),
    )
    return pl.pallas_call(
        _softmax_rescale_kernel,
        out_shape=jax.ShapeDtypeStruct((B, L, D), jnp.float32),
        grid_spec=grid_spec,
        compiler_params=pltpu.CompilerParams(
            dimension_semantics=("parallel",),
            vmem_limit_bytes=_VMEM_LIMIT),
    )(proteins_num, h)


def reference_forward(seq_emb, proteins_num, w_enc):
    """Pure-JAX reference mirroring the PyTorch forward (same bf16 encoder stub)."""
    B, L, Din = seq_emb.shape
    h = jnp.dot(seq_emb.reshape(B * L, Din).astype(jnp.bfloat16),
                w_enc.astype(jnp.bfloat16),
                preferred_element_type=jnp.float32).reshape(B, L, -1)
    norm = jnp.linalg.norm(h, axis=2)                         # (B, L)
    mask = jnp.arange(L)[None, :] < proteins_num[:, None]     # (B, L)
    norm = jnp.where(mask, norm, -1e10)
    attn = jax.nn.softmax(norm, axis=1)[..., None]            # (B, L, 1)
    return h * attn


if __name__ == "__main__":
    key = jax.random.PRNGKey(0)
    # Small but (8,128)-aligned, lane-dense shapes (D multiple of 128).
    B, L, Din, D = 2, 256, 128, 128

    k1, k2 = jax.random.split(key)
    seq_emb = jax.random.normal(k1, (B, L, Din), dtype=jnp.float32)
    # deterministic "encoder" weight (stands in for the pretrained T5 weights)
    w_enc = (jax.random.normal(k2, (Din, D), dtype=jnp.float32)
             / jnp.sqrt(jnp.float32(Din)))
    proteins_num = jnp.array([256, 170], dtype=jnp.int32)

    fwd = jax.jit(prottrans_forward)
    out = jax.block_until_ready(fwd(seq_emb, proteins_num, w_enc))

    ref = reference_forward(seq_emb, proteins_num, w_enc)
    assert out.shape == (B, L, D)
    # bf16 MXU feed + approx reciprocal in the softmax denominator => loosened tol
    assert jnp.allclose(out, ref, atol=1e-3, rtol=1e-3), "mismatch vs reference"

    print("KERNEL_OK")
</pallas_src>

<mosaic_0001>
module attributes {stable_mosaic.version = 11 : i64} {
  func.func @_softmax_rescale_kernel(%arg0: i32, %arg1: memref<2xi32, #tpu.memory_space<smem>>, %arg2: memref<1x256x128xf32, #tpu.memory_space<vmem>>, %arg3: memref<1x256x128xf32, #tpu.memory_space<vmem>>) attributes {dimension_semantics = [#tpu.dimension_semantics<parallel>], iteration_bounds = array<i64: 2>, scalar_prefetch = 1 : i64, scratch_operands = 0 : i64, tpu.core_type = #tpu.core_type<tc>, window_params = [{transform_indices = @transform_0, window_bounds = array<i64: 1, 256, 128>}, {transform_indices = @transform_1, window_bounds = array<i64: 1, 256, 128>}]} {
    %0 = arith.index_cast %arg0 : i32 to index
    %1 = memref.load %arg1[%0] : memref<2xi32, #tpu.memory_space<smem>>
    %c0 = arith.constant 0 : index
    %c0_0 = arith.constant 0 : index
    %c0_1 = arith.constant 0 : index
    %2 = vector.load %arg2[%c0, %c0_0, %c0_1] : memref<1x256x128xf32, #tpu.memory_space<vmem>>, vector<1x256x128xf32>
    %3 = vector.shape_cast %2 : vector<1x256x128xf32> to vector<256x128xf32>
    %4 = arith.mulf %3, %3 : vector<256x128xf32>
    %cst = arith.constant dense<0.000000e+00> : vector<256xf32>
    %5 = vector.multi_reduction <add>, %4, %cst [1] : vector<256x128xf32> to vector<256xf32>
    %6 = vector.shape_cast %5 : vector<256xf32> to vector<256x1xf32>
    %7 = math.sqrt %6 : vector<256x1xf32>
    %8 = tpu.iota {dimensions = array<i32: 0>} : vector<256x1xi32>
    %9 = vector.broadcast %1 : i32 to vector<256x1xi32>
    %10 = arith.cmpi slt, %8, %9 : vector<256x1xi32>
    %cst_2 = arith.constant -1.000000e+10 : f32
    %11 = vector.broadcast %cst_2 : f32 to vector<256x1xf32>
    %12 = arith.select %10, %7, %11 : vector<256x1xi1>, vector<256x1xf32>
    %cst_3 = arith.constant dense<0xFF800000> : vector<1xf32>
    %13 = vector.multi_reduction <maximumf>, %12, %cst_3 [0] : vector<256x1xf32> to vector<1xf32>
    %14 = vector.shape_cast %13 : vector<1xf32> to vector<1x1xf32>
    %15 = vector.broadcast %14 : vector<1x1xf32> to vector<256x1xf32>
    %16 = arith.subf %12, %15 : vector<256x1xf32>
    %17 = math.exp %16 : vector<256x1xf32>
    %cst_4 = arith.constant dense<0.000000e+00> : vector<1xf32>
    %18 = vector.multi_reduction <add>, %17, %cst_4 [0] : vector<256x1xf32> to vector<1xf32>
    %19 = vector.shape_cast %18 : vector<1xf32> to vector<1x1xf32>
    %20 = tpu.reciprocal %19 {approx = true} : vector<1x1xf32> -> vector<1x1xf32>
    %21 = vector.broadcast %20 : vector<1x1xf32> to vector<256x1xf32>
    %22 = arith.mulf %17, %21 : vector<256x1xf32>
    %c0_5 = arith.constant 0 : index
    %c0_6 = arith.constant 0 : index
    %c0_7 = arith.constant 0 : index
    %23 = vector.load %arg2[%c0_5, %c0_6, %c0_7] : memref<1x256x128xf32, #tpu.memory_space<vmem>>, vector<1x256x128xf32>
    %24 = vector.shape_cast %23 : vector<1x256x128xf32> to vector<256x128xf32>
    %25 = vector.broadcast %22 : vector<256x1xf32> to vector<256x128xf32>
    %26 = arith.mulf %24, %25 : vector<256x128xf32>
    %c0_8 = arith.constant 0 : index
    %c0_9 = arith.constant 0 : index
    %c0_10 = arith.constant 0 : index
    %27 = vector.load %arg3[%c0_8, %c0_9, %c0_10] : memref<1x256x128xf32, #tpu.memory_space<vmem>>, vector<1x256x128xf32>
    %28 = vector.shape_cast %27 : vector<1x256x128xf32> to vector<256x128xf32>
    %29 = vector.shape_cast %26 : vector<256x128xf32> to vector<1x256x128xf32>
    tpu.vector_store %arg3[%c0_8, %c0_9, %c0_10], %29 {strides = array<i32>} : memref<1x256x128xf32, #tpu.memory_space<vmem>>, vector<1x256x128xf32>,
    return
  }
  func.func @transform_0(%arg0: i32, %arg1: memref<2xi32, #tpu.memory_space<smem>>) -> (i32, i32, i32) {
    %c0_i32 = arith.constant 0 : i32
    %c0_i32_0 = arith.constant 0 : i32
    %c0_i32_1 = arith.constant 0 : i32
    return %arg0, %c0_i32, %c0_i32_0 : i32, i32, i32
  }
  func.func @transform_1(%arg0: i32, %arg1: memref<2xi32, #tpu.memory_space<smem>>) -> (i32, i32, i32) {
    %c0_i32 = arith.constant 0 : i32
    %c0_i32_0 = arith.constant 0 : i32
    %c0_i32_1 = arith.constant 0 : i32
    return %arg0, %c0_i32, %c0_i32_0 : i32, i32, i32
  }
}

module attributes {stable_mosaic.version = 11 : i64} {
  func.func @_matmul_kernel(%arg0: i32, %arg1: i32, %arg2: i32, %arg3: memref<512x128xbf16, #tpu.memory_space<vmem>>, %arg4: memref<128x128xbf16, #tpu.memory_space<vmem>>, %arg5: memref<512x128xf32, #tpu.memory_space<vmem>>, %arg6: memref<512x128xf32, #tpu.memory_space<vmem>>) attributes {dimension_semantics = [#tpu.dimension_semantics<parallel>, #tpu.dimension_semantics<parallel>, #tpu.dimension_semantics<arbitrary>], iteration_bounds = array<i64: 1, 1, 1>, scalar_prefetch = 0 : i64, scratch_operands = 1 : i64, tpu.core_type = #tpu.core_type<tc>, window_params = [{transform_indices = @transform_0, window_bounds = array<i64: 512, 128>}, {transform_indices = @transform_1, window_bounds = array<i64: 128, 128>}, {transform_indices = @transform_2, window_bounds = array<i64: 512, 128>}]} {
    %c0_i32 = arith.constant 0 : i32
    %0 = arith.cmpi eq, %arg2, %c0_i32 : i32
    %1 = arith.extui %0 : i1 to i32
    %c0_i32_0 = arith.constant 0 : i32
    %2 = arith.cmpi ne, %1, %c0_i32_0 : i32
    scf.if %2 {
      %cst_10 = arith.constant 0.000000e+00 : f32
      %12 = vector.broadcast %cst_10 : f32 to vector<512x128xf32>
      %c0_11 = arith.constant 0 : index
      %c0_12 = arith.constant 0 : index
      %13 = vector.load %arg6[%c0_11, %c0_12] : memref<512x128xf32, #tpu.memory_space<vmem>>, vector<512x128xf32>
      tpu.vector_store %arg6[%c0_11, %c0_12], %12 {strides = array<i32>} : memref<512x128xf32, #tpu.memory_space<vmem>>, vector<512x128xf32>,
    } else {
    }
    %c0 = arith.constant 0 : index
    %c0_1 = arith.constant 0 : index
    %3 = vector.load %arg6[%c0, %c0_1] : memref<512x128xf32, #tpu.memory_space<vmem>>, vector<512x128xf32>
    %c0_2 = arith.constant 0 : index
    %c0_3 = arith.constant 0 : index
    %4 = vector.load %arg3[%c0_2, %c0_3] : memref<512x128xbf16, #tpu.memory_space<vmem>>, vector<512x128xbf16>
    %c0_4 = arith.constant 0 : index
    %c0_5 = arith.constant 0 : index
    %5 = vector.load %arg4[%c0_4, %c0_5] : memref<128x128xbf16, #tpu.memory_space<vmem>>, vector<128x128xbf16>
    %cst = arith.constant dense<0.000000e+00> : vector<512x128xf32>
    %6 = tpu.matmul %4, %5, %cst {dimension_numbers = #tpu.dot_dimension_numbers<[1], [0], [0], [1], [0, 0, 1, 1], [], []>} : vector<512x128xbf16>, vector<128x128xbf16>, vector<512x128xf32> -> vector<512x128xf32>
    %7 = arith.addf %3, %6 : vector<512x128xf32>
    %c0_6 = arith.constant 0 : index
    %c0_7 = arith.constant 0 : index
    %8 = vector.load %arg6[%c0_6, %c0_7] : memref<512x128xf32, #tpu.memory_space<vmem>>, vector<512x128xf32>
    tpu.vector_store %arg6[%c0_6, %c0_7], %7 {strides = array<i32>} : memref<512x128xf32, #tpu.memory_space<vmem>>, vector<512x128xf32>,
    %c0_i32_8 = arith.constant 0 : i32
    %9 = arith.cmpi eq, %arg2, %c0_i32_8 : i32
    %10 = arith.extui %9 : i1 to i32
    %c0_i32_9 = arith.constant 0 : i32
    %11 = arith.cmpi ne, %10, %c0_i32_9 : i32
    scf.if %11 {
      %c0_10 = arith.constant 0 : index
      %c0_11 = arith.constant 0 : index
      %12 = vector.load %arg6[%c0_10, %c0_11] : memref<512x128xf32, #tpu.memory_space<vmem>>, vector<512x128xf32>
      %c0_12 = arith.constant 0 : index
      %c0_13 = arith.constant 0 : index
      %13 = vector.load %arg5[%c0_12, %c0_13] : memref<512x128xf32, #tpu.memory_space<vmem>>, vector<512x128xf32>
      tpu.vector_store %arg5[%c0_12, %c0_13], %12 {strides = array<i32>} : memref<512x128xf32, #tpu.memory_space<vmem>>, vector<512x128xf32>,
    } else {
    }
    return
  }
  func.func @transform_0(%arg0: i32, %arg1: i32, %arg2: i32) -> (i32, i32) {
    %c0_i32 = arith.constant 0 : i32
    return %arg0, %arg2 : i32, i32
  }
  func.func @transform_1(%arg0: i32, %arg1: i32, %arg2: i32) -> (i32, i32) {
    %c0_i32 = arith.constant 0 : i32
    return %arg2, %arg1 : i32, i32
  }
  func.func @transform_2(%arg0: i32, %arg1: i32, %arg2: i32) -> (i32, i32) {
    %c0_i32 = arith.constant 0 : i32
    return %arg0, %arg1 : i32, i32
  }
}

</mosaic_0001>

<bundles_post_ra>
// kernel: prottrans_forward.3
= control target key start
LH: loop header
LB: loop body
LE: loop exit
PB: predicated region body
PF: predicated region fallthrough
CT: control target
= control target key end

     0   :  { %s2387_s0 = inlined_call_operand.vmem [shape: s32[2], index: 0, kind: input, shape index: {}]   ;;  %s2388_s1 = inlined_call_operand.vmem [shape: f32[2,256,128], index: 1, kind: input, shape index: {}]   ;;  %s2389_s2 = inlined_call_operand.hbm [shape: f32[2,256,128], index: 2, kind: output, shape index: {}]  }
   0x1   :  { %s7_s11 = sshll.u32 %s2387_s0, 4  ;;  %s8_s11 = int_to_ptr.vmem [resolvable:$true] %s7_s11 }
   0x2   :  { %s1134_s12 = scalar_lea.vmem %s8_s11, 16  ;;  %p1139_p1 = scmp.lt.s32.totalorder %s8_s11, %s8_s11 }
   0x3   :  { %p1135_p0 = scmp.ne.s32.totalorder %s8_s11, %s1134_s12  ;;  %p1140_p2 = scmp.lt.s32.totalorder %s1134_s12, %s1134_s12 }
   0x5   :  { %p1141_p3 = por %p1140_p2, %p1139_p1 }
   0x7   :  { %p1142_p4 = pnand %p1141_p3, %p1135_p0 }
   0x9   :  { %1145 = shalt.err (!%p1142_p4)  }
   0xa   :  { %s1212_s13 = smov [#allocation3]  }
   0xb   :  { %10 = dma.vmem_to_smem %s8_s11, 16, %s1212_s13, [#allocation2] }
   0xc   :  { %1190 = dma.done.wait [#allocation2], 16 }
   0xd   :  { %1191 = vsyncadd [#allocation2], 4294967280 }
   0xe   :  { %12 = sfence }
   0xf   :  { %13 = vsyncpa [#allocation5], 0 }
  0x10   :  { %15 = vsyncpa [#allocation5 + $0x1], 0  ;;  %s1234_s14 = smov 0   ;;  %s1236_s15 = smov 0  }
  0x11   :  { %s1238_s0 = smov 0   ;;  %s1240_s16 = smov 0  }
  0x12 LB: > { %s1255_s17 = sadd.s32 4294967295, %s1210_s16   ;;  %s916_s18 = sadd.s32 4294967294, %s1210_s16   ;;  %s1210_s16 = sphi %s1240_s16, %s2410_s16   ;;  %s1206_s0 = sphi %s1238_s0, %s2409_s0   ;;  %s1202_s15 = sphi %s1236_s15, %s2408_s15   ;;  %s1198_s14 = sphi %s1234_s14, %s2407_s14  }
  0x13   : > { %s1259_s19 = sadd.s32 1, %s1210_s16   ;;  %s54_s20 = sadd.s32 1, %s1206_s0 }
  0x14   : > { %s51_s21 = ssub.s32 %s1210_s16, %s1259_s19  ;;  %p64_p5 = scmp.ne.s32.totalorder %s1206_s0, %s1202_s15 }
  0x15   : > { %p52_p6 = scmp.eq.s32.totalorder %s51_s21, 0  ;;  %p65_p7 = scmp.eq.s32.totalorder %s1255_s17, 1 }
  0x16   : > { %p70_p8 = scmp.ne.s32.totalorder %s1202_s15, %s1198_s14  ;;  %p71_p9 = scmp.eq.s32.totalorder %s916_s18, 1 }
  0x17   : > { %s1270_s22 = scalar_select %p52_p6, %s1206_s0, %s54_s20  }
  0x18   : > { %p1272_p10 = por %p65_p7, %p64_p5  ;;  %p1276_p11 = por %p71_p9, %p70_p8 }
  0x19   : > { %p919_p12 = scmp.ge.s32.totalorder %s1210_s16, 1  ;;  %p97_p13 = scmp.lt.s32.totalorder %s1210_s16, 3 }
  0x1b   : > { %p98_p0 = pnand %p919_p12, %p97_p13 }
  0x1d   : > { %101 = sbr.rel (%p98_p0) target bundleno = 434 (0x1b2), region = 24 }
  0x24   : > { %p117_p1 = scmp.lt.s32.totalorder %s1255_s17, 1  ;;  %s122_s30 = sld [smem:[#allocation3 + %s1255_s17]] }
  0x25   : > { %s114_s3 = sand.u32 1, %s1202_s15   ;;  %s929_s6 = sshll.u32 %s1255_s17, 12 }
  0x26   : > { %s118_s25 = scalar_select %p117_p1, %s1255_s17, 1 }
  0x27   : > { %s920_s4 = sshll.u32 %s114_s3, 8  ;;  %s2318_s10 = scalar_lea.hbm %s2389_s2, %s929_s6 }
  0x28   : > { %s928_s26 = sshll.u32 %s118_s25, 8  ;;  %s2221_s5 = scalar_lea.vmem [#allocation4], %s920_s4 }
  0x29   : > { %s1287_s29 = scalar_lea.vmem %s2388_s1, %s928_s26  ;;  %s854_s7 = sshll.u32 %s2221_s5, 4  ;;  %s2322_s7 = int_to_ptr.vmem [resolvable:$true] %s854_s7 }
  0x2a   : > { %v125_v0 = vld [vmem:[%s1287_s29 + $0x10] sm:$0xff]  ;;  %v123_v1 = vld [vmem:[%s1287_s29] sm:$0xff]  ;;  %v126_v2 = vld [vmem:[%s1287_s29 + $0x18] sm:$0xff]  ;;  %s2346_s11 = scalar_lea.sflag [#allocation5], %s114_s3  ;;  %s1146_s12 = scalar_lea.vmem %s2322_s7, 4096 }
  0x2b   : > { %v157_v3 = vmul.f32 %v125_v0, %v125_v0  ;;  %v155_v4 = vmul.f32 %v123_v1, %v123_v1  ;;  %v124_v5 = vld [vmem:[%s1287_s29 + $0x8] sm:$0xff]  ;;  %v158_v6 = vmul.f32 %v126_v2, %v126_v2  ;;  %v127_v9 = vld [vmem:[%s1287_s29 + $0x20] sm:$0xff]  ;;  %v130_v12 = vld [vmem:[%s1287_s29 + $0x38] sm:$0xff]  ;;  %v475_v0 = vlaneseq  ;;  %p1147_p2 = scmp.ne.s32.totalorder %s2322_s7, %s1146_s12  ;;  %s1213_s13 = smov [#allocation4]  }
  0x2c   : > { %v156_v7 = vmul.f32 %v124_v5, %v124_v5  ;;  %v128_v8 = vld [vmem:[%s1287_s29 + $0x28] sm:$0xff]  ;;  %v159_v11 = vmul.f32 %v127_v9, %v127_v9  ;;  %v129_v13 = vld [vmem:[%s1287_s29 + $0x30] sm:$0xff]  ;;  %v162_v14 = vmul.f32 %v130_v12, %v130_v12  ;;  %v131_v17 = vld [vmem:[%s1287_s29 + $0x40] sm:$0xff]  ;;  %s1150_s17 = sshll.u32 %s1213_s13, 4  ;;  %s1151_s17 = int_to_ptr.vmem [resolvable:$false] %s1150_s17 }
  0x2d   : > { %191 = vadd.xlane.f32.xlu1 %v157_v3  ;;  %187 = vadd.xlane.f32.xlu0 %v155_v4  ;;  %v160_v10 = vmul.f32 %v128_v8, %v128_v8  ;;  %v161_v15 = vmul.f32 %v129_v13, %v129_v13  ;;  %v132_v16 = vld [vmem:[%s1287_s29 + $0x48] sm:$0xff]  ;;  %v163_v19 = vmul.f32 %v131_v17, %v131_v17  ;;  %v134_v20 = vld [vmem:[%s1287_s29 + $0x58] sm:$0xff]  ;;  %v133_v21 = vld [vmem:[%s1287_s29 + $0x50] sm:$0xff]  ;;  %v1326_v3 = vshrl.u32 %v475_v0, 7  ;;  %p1148_p3 = pnand %p1147_p2, %p1272_p10  ;;  %s1152_s18 = scalar_lea.vmem %s1151_s17, 8192 }
  0x2e   : > { %v164_v18 = vmul.f32 %v132_v16, %v132_v16  ;;  %v166_v22 = vmul.f32 %v134_v20, %v134_v20  ;;  %v165_v23 = vmul.f32 %v133_v21, %v133_v21  ;;  %v136_v24 = vld [vmem:[%s1287_s29 + $0x68] sm:$0xff]  ;;  %v135_v25 = vld [vmem:[%s1287_s29 + $0x60] sm:$0xff]  ;;  %v138_v28 = vld [vmem:[%s1287_s29 + $0x78] sm:$0xff]  ;;  %p1153_p5 = scmp.lt.s32.totalorder %s2322_s7, %s1151_s17  ;;  %p1154_p6 = scmp.lt.s32.totalorder %s1152_s18, %s1146_s12 }
  0x2f   : > { %v168_v26 = vmul.f32 %v136_v24, %v136_v24  ;;  %v167_v27 = vmul.f32 %v135_v25, %v135_v25  ;;  %v137_v29 = vld [vmem:[%s1287_s29 + $0x70] sm:$0xff]  ;;  %v170_v30 = vmul.f32 %v138_v28, %v138_v28  ;;  %v140_v32 = vld [vmem:[%s1287_s29 + $0x88] sm:$0xff]  ;;  %v139_v33 = vld [vmem:[%s1287_s29 + $0x80] sm:$0xff]  ;;  %v1340_v8 = vadd.s32 24, %v1326_v3  ;;  %p1149_p4 = pneg %p1148_p3 }
  0x30   : > { %v169_v31 = vmul.f32 %v137_v29, %v137_v29  ;;  %v172_v34 = vmul.f32 %v140_v32, %v140_v32  ;;  %v171_v35 = vmul.f32 %v139_v33, %v139_v33  ;;  %v142_v36 = vld [vmem:[%s1287_s29 + $0x98] sm:$0xff]  ;;  %v141_v37 = vld [vmem:[%s1287_s29 + $0x90] sm:$0xff]  ;;  %v144_v40 = vld [vmem:[%s1287_s29 + $0xa8] sm:$0xff]  ;;  %v1344_v9 = vadd.s32 8, %v1326_v3  ;;  %p1155_p7 = por %p1154_p6, %p1153_p5 }
  0x31   : > { %193 = vadd.xlane.f32.xlu1 %v158_v6  ;;  %189 = vadd.xlane.f32.xlu0 %v156_v7  ;;  %v174_v38 = vmul.f32 %v142_v36, %v142_v36  ;;  %v173_v39 = vmul.f32 %v141_v37, %v141_v37  ;;  %v143_v41 = vld [vmem:[%s1287_s29 + $0xa0] sm:$0xff]  ;;  %v176_v42 = vmul.f32 %v144_v40, %v144_v40  ;;  %v146_v44 = vld [vmem:[%s1287_s29 + $0xb8] sm:$0xff]  ;;  %v145_v45 = vld [vmem:[%s1287_s29 + $0xb0] sm:$0xff]  ;;  %v1335_v6 = vadd.s32 16, %v1326_v3 }
  0x32   : > { %v175_v43 = vmul.f32 %v143_v41, %v143_v41  ;;  %v178_v46 = vmul.f32 %v146_v44, %v146_v44  ;;  %v177_v47 = vmul.f32 %v145_v45, %v145_v45  ;;  %v148_v48 = vld [vmem:[%s1287_s29 + $0xc8] sm:$0xff]  ;;  %v147_v49 = vld [vmem:[%s1287_s29 + $0xc0] sm:$0xff]  ;;  %v150_v52 = vld [vmem:[%s1287_s29 + $0xd8] sm:$0xff]  ;;  %v1337_v7 = vstv %s122_s30  ;;  %p1156_p8 = pnand %p1155_p7, %p1149_p4 }
  0x33   : > { %v180_v50 = vmul.f32 %v148_v48, %v148_v48  ;;  %v179_v51 = vmul.f32 %v147_v49, %v147_v49  ;;  %v149_v53 = vld [vmem:[%s1287_s29 + $0xd0] sm:$0xff]  ;;  %v182_v54 = vmul.f32 %v150_v52, %v150_v52  ;;  %v152_v56 = vld [vmem:[%s1287_s29 + $0xe8] sm:$0xff]  ;;  %v151_v57 = vld [vmem:[%s1287_s29 + $0xe0] sm:$0xff]  ;;  %v1355_v13 = vadd.s32 32, %v1326_v3 }
  0x34   : > { %v181_v55 = vmul.f32 %v149_v53, %v149_v53  ;;  %v184_v58 = vmul.f32 %v152_v56, %v152_v56  ;;  %v183_v59 = vmul.f32 %v151_v57, %v151_v57  ;;  %v154_v60 = vld [vmem:[%s1287_s29 + $0xf8] sm:$0xff]  ;;  %v153_v61 = vld [vmem:[%s1287_s29 + $0xf0] sm:$0xff]  ;;  %v1365_v16 = vadd.s32 72, %v1326_v3 }
  0x35   : > { %197 = vadd.xlane.f32.xlu1 %v160_v10  ;;  %195 = vadd.xlane.f32.xlu0 %v159_v11  ;;  %v186_v62 = vmul.f32 %v154_v60, %v154_v60  ;;  %v185_v63 = vmul.f32 %v153_v61, %v153_v61  ;;  %v1347_v10 = vadd.s32 40, %v1326_v3  ;;  %v1368_v17 = vadd.s32 64, %v1326_v3 }
  0x36   : > { %v1378_v20 = vadd.s32 104, %v1326_v3  ;;  %v1381_v21 = vadd.s32 96, %v1326_v3  ;;  %v1388_v24 = vadd.s32 120, %v1326_v3  ;;  %v1391_v25 = vadd.s32 112, %v1326_v3 }
  0x37   : > { %v1401_v28 = vadd.s32 152, %v1326_v3  ;;  %v1404_v29 = vadd.s32 144, %v1326_v3  ;;  %v1411_v32 = vadd.s32 160, %v1326_v3  ;;  %v1414_v33 = vadd.s32 184, %v1326_v3 }
  0x38   : > { %v1420_v36 = vadd.s32 200, %v1326_v3  ;;  %v1423_v37 = vadd.s32 192, %v1326_v3  ;;  %v1442_v44 = vadd.s32 248, %v1326_v3  ;;  %v1445_v45 = vadd.s32 240, %v1326_v3 }
  0x39   : > { %201 = vadd.xlane.f32.xlu1 %v162_v14  ;;  %199 = vadd.xlane.f32.xlu0 %v161_v15  ;;  %v1358_v14 = vadd.s32 56, %v1326_v3  ;;  %v1361_v15 = vadd.s32 48, %v1326_v3  ;;  %vm511_vm0 = vcmp.lt.s32.totalorder %v1335_v6, %v1337_v7  ;;  %vm509_vm3 = vcmp.lt.s32.totalorder %v1326_v3, %v1337_v7 }
  0x3a   : > { %2395 = vst [vmem:[#allocation8_spill] sm:$0xff] %v1442_v44  ;;  %2396 = vst [vmem:[#allocation9_spill] sm:$0xff] %v1445_v45 }
  0x3d   : > { %205 = vadd.xlane.f32.xlu1 %v164_v18  ;;  %203 = vadd.xlane.f32.xlu0 %v163_v19  ;;  %v1371_v18 = vadd.s32 88, %v1326_v3  ;;  %v1375_v19 = vadd.s32 80, %v1326_v3 }
  0x41   : > { %209 = vadd.xlane.f32.xlu1 %v166_v22  ;;  %207 = vadd.xlane.f32.xlu0 %v165_v23 }
  0x45   : > { %213 = vadd.xlane.f32.xlu1 %v168_v26  ;;  %211 = vadd.xlane.f32.xlu0 %v167_v27  ;;  %v1394_v26 = vadd.s32 136, %v1326_v3  ;;  %v1397_v27 = vadd.s32 128, %v1326_v3 }
  0x49   : > { %217 = vadd.xlane.f32.xlu1 %v170_v30  ;;  %215 = vadd.xlane.f32.xlu0 %v169_v31  ;;  %v1407_v30 = vadd.s32 168, %v1326_v3 }
  0x4d   : > { %221 = vadd.xlane.f32.xlu1 %v172_v34  ;;  %219 = vadd.xlane.f32.xlu0 %v171_v35  ;;  %v1417_v34 = vadd.s32 176, %v1326_v3 }
  0x51   : > { %225 = vadd.xlane.f32.xlu1 %v174_v38  ;;  %223 = vadd.xlane.f32.xlu0 %v173_v39  ;;  %v1426_v38 = vadd.s32 216, %v1326_v3  ;;  %v1429_v39 = vadd.s32 208, %v1326_v3 }
  0x55   : > { %229 = vadd.xlane.f32.xlu1 %v176_v42  ;;  %227 = vadd.xlane.f32.xlu0 %v175_v43  ;;  %v1436_v42 = vadd.s32 232, %v1326_v3  ;;  %v1439_v43 = vadd.s32 224, %v1326_v3 }
  0x59   : > { %233 = vadd.xlane.f32.xlu1 %v178_v46  ;;  %231 = vadd.xlane.f32.xlu0 %v177_v47 }
  0x5d   : > { %237 = vadd.xlane.f32.xlu1 %v180_v50  ;;  %235 = vadd.xlane.f32.xlu0 %v179_v51 }
  0x61   : > { %241 = vadd.xlane.f32.xlu1 %v182_v54  ;;  %239 = vadd.xlane.f32.xlu0 %v181_v55 }
  0x65   : > { %245 = vadd.xlane.f32.xlu1 %v184_v58  ;;  %243 = vadd.xlane.f32.xlu0 %v183_v59 }
  0x69   : > { %249 = vadd.xlane.f32.xlu1 %v186_v62  ;;  %247 = vadd.xlane.f32.xlu0 %v185_v63 }
  0xba   : > { %v1322_v1 = vpop.xlane.xlu1 %191  ;;  %v1324_v2 = vpop.xlane.xlu0 %187 }
  0xbb   : > { %972 = vrsqrt.f32 %v1322_v1  ;;  %vm267_vm1 = vcmp.eq.f32.partialorder %v1322_v1, inf  ;;  %vm269_vm2 = vcmp.eq.f32.partialorder %v1322_v1, 0.0  ;;  %v270_v48 = vand.u32 2147483648, %v1322_v1 }
  0xbc   : > { %974 = vrsqrt.f32 %v1324_v2  ;;  %vm253_vm4 = vcmp.eq.f32.partialorder %v1324_v2, inf  ;;  %vm255_vm5 = vcmp.eq.f32.partialorder %v1324_v2, 0.0  ;;  %v256_v51 = vand.u32 2147483648, %v1324_v2 }
  0xbe   : > { %v1329_v4 = vpop.xlane.xlu1 %193  ;;  %v1331_v5 = vpop.xlane.xlu0 %189 }
  0xbf   : > { %976 = vrsqrt.f32 %v1329_v4  ;;  %vm274_vm6 = vcmp.eq.f32.partialorder %v1329_v4, inf  ;;  %v277_v52 = vand.u32 2147483648, %v1329_v4  ;;  %vm276_vm7 = vcmp.eq.f32.partialorder %v1329_v4, 0.0 }
  0xc0   : > { %978 = vrsqrt.f32 %v1331_v5  ;;  %vm260_vm8 = vcmp.eq.f32.partialorder %v1331_v5, inf  ;;  %vm262_vm9 = vcmp.eq.f32.partialorder %v1331_v5, 0.0  ;;  %v263_v54 = vand.u32 2147483648, %v1331_v5 }
  0xc2   : > { %v1349_v11 = vpop.xlane.xlu1 %197  ;;  %v1351_v12 = vpop.xlane.xlu0 %195 }
  0xc3   : > { %980 = vrsqrt.f32 %v1349_v11  ;;  %vm288_vm10 = vcmp.eq.f32.partialorder %v1349_v11, inf  ;;  %vm290_vm13 = vcmp.eq.f32.partialorder %v1349_v11, 0.0  ;;  %v291_v59 = vand.u32 2147483648, %v1349_v11 }
  0xc4   : > { %982 = vrsqrt.f32 %v1351_v12  ;;  %vm281_vm14 = vcmp.eq.f32.partialorder %v1351_v12, inf  ;;  %vm283_vm12 = vcmp.eq.f32.partialorder %v1351_v12, 0.0 }
  0xc5   : > { %v973_v31 = vpop.eup %972 }
  0xc6   : > { %v1383_v22 = vpop.xlane.xlu1 %201  ;;  %v1385_v23 = vpop.xlane.xlu0 %199  ;;  %v266_v46 = vmul.f32 %v973_v31, %v1322_v1  ;;  %v284_v31 = vand.u32 2147483648, %v1351_v12 }
  0xc7   : > { %984 = vrsqrt.f32 %v1383_v22  ;;  %v975_v35 = vpop.eup %974  ;;  %vm304_vm15 = vcmp.eq.f32.partialorder %v1383_v22, 0.0  ;;  %vm295_vm11 = vcmp.eq.f32.partialorder %v1385_v23, inf }
  0xc8   : > { %986 = vrsqrt.f32 %v1385_v23  ;;  %v252_v49 = vmul.f32 %v975_v35, %v1324_v2  ;;  %v268_v58 = vsel %vm267_vm1, %v1322_v1, %v266_v46  ;;  %vm516_vm1 = vcmp.lt.s32.totalorder %v1358_v14, %v1337_v7 }
  0xc9   : > { %v977_v47 = vpop.eup %976 }
  0xca   : > { %v1431_v40 = vpop.xlane.xlu1 %205  ;;  %v1433_v41 = vpop.xlane.xlu0 %203  ;;  %v254_v60 = vsel %vm253_vm4, %v1324_v2, %v252_v49  ;;  %v273_v61 = vmul.f32 %v977_v47, %v1329_v4  ;;  %vm302_vm4 = vcmp.eq.f32.partialorder %v1383_v22, inf  ;;  %v305_v47 = vand.u32 2147483648, %v1383_v22 }
  0xcb   : > { %988 = vrsqrt.f32 %v1431_v40  ;;  %v979_v50 = vpop.eup %978  ;;  %v257_v45 = vsel %vm255_vm5, %v256_v51, %v254_v60  ;;  %vm515_vm5 = vcmp.lt.s32.totalorder %v1361_v15, %v1337_v7  ;;  %v319_v3 = vand.u32 2147483648, %v1431_v40 }
  0xcc   : > { %990 = vrsqrt.f32 %v1433_v41  ;;  %v259_v62 = vmul.f32 %v979_v50, %v1331_v5 }
  0xcd   : > { %v981_v53 = vpop.eup %980 }
  0xce   : > { %v1468_v55 = vpop.xlane.xlu1 %209  ;;  %v1470_v56 = vpop.xlane.xlu0 %207  ;;  %v287_v0 = vmul.f32 %v981_v53, %v1349_v11  ;;  %v271_v53 = vsel %vm269_vm2, %v270_v48, %v268_v58  ;;  %v261_v44 = vsel %vm260_vm8, %v1331_v5, %v259_v62  ;;  %vm297_vm2 = vcmp.eq.f32.partialorder %v1385_v23, 0.0 }
  0xcf   : > { %v983_v57 = vpop.eup %982  ;;  %992 = vrsqrt.f32 %v1468_v55  ;;  %v298_v58 = vand.u32 2147483648, %v1385_v23  ;;  %v1536_v62 = vsel %vm509_vm3, %v257_v45, -1e+10  ;;  %vm309_vm3 = vcmp.eq.f32.partialorder %v1433_v41, inf }
  0xd0   : > { %994 = vrsqrt.f32 %v1470_v56  ;;  %v280_v46 = vmul.f32 %v983_v57, %v1351_v12  ;;  %v275_v57 = vsel %vm274_vm6, %v1329_v4, %v273_v61  ;;  %v289_v48 = vsel %vm288_vm10, %v1349_v11, %v287_v0 }
  0xd1   : > { %v985_v63 = vpop.eup %984  ;;  %v1531_v61 = vsel %vm511_vm0, %v271_v53, -1e+10  ;;  %vm316_vm6 = vcmp.eq.f32.partialorder %v1431_v40, inf  ;;  %v278_v6 = vsel %vm276_vm7, %v277_v52, %v275_v57  ;;  %v264_v53 = vsel %vm262_vm9, %v263_v54, %v261_v44 }
  0xd2   : > { %v987_v35 = vpop.eup %986  ;;  %v1500_v49 = vpop.xlane.xlu1 %213  ;;  %v301_v1 = vmul.f32 %v985_v63, %v1383_v22  ;;  %v282_v63 = vsel %vm281_vm14, %v1351_v12, %v280_v46  ;;  %vm318_vm0 = vcmp.eq.f32.partialorder %v1431_v40, 0.0  ;;  %v292_v45 = vsel %vm290_vm13, %v291_v59, %v289_v48 }
  0xd3   : > { %v1502_v50 = vpop.xlane.xlu0 %211  ;;  %996 = vrsqrt.f32 %v1500_v49  ;;  %v294_v51 = vmul.f32 %v987_v35, %v1385_v23  ;;  %vm518_vm8 = vcmp.lt.s32.totalorder %v1365_v16, %v1337_v7  ;;  %vm517_vm7 = vcmp.lt.s32.totalorder %v1368_v17, %v1337_v7 }
  0xd4   : > { %998 = vrsqrt.f32 %v1502_v50  ;;  %v303_v46 = vsel %vm302_vm4, %v1383_v22, %v301_v1  ;;  %vm311_vm9 = vcmp.eq.f32.partialorder %v1433_v41, 0.0  ;;  %v285_v4 = vsel %vm283_vm12, %v284_v31, %v282_v63 }
  0xd5   : > { %v989_v2 = vpop.eup %988  ;;  %v296_v5 = vsel %vm295_vm11, %v1385_v23, %v294_v51  ;;  %vm2397_vm10 = vcmp.lt.s32.totalorder %v1340_v8, %v1337_v7  ;;  %vm2398_vm13 = vcmp.lt.s32.totalorder %v1344_v9, %v1337_v7  ;;  %v312_v12 = vand.u32 2147483648, %v1433_v41 }
  0xd6   : > { %v991_v60 = vpop.eup %990  ;;  %v1542_v0 = vpop.xlane.xlu1 %217  ;;  %v315_v11 = vmul.f32 %v989_v2, %v1431_v40  ;;  %v1574_v54 = vsel %vm2397_vm10, %v278_v6, -1e+10  ;;  %v1579_v59 = vsel %vm2398_vm13, %v264_v53, -1e+10  ;;  %vm330_vm12 = vcmp.eq.f32.partialorder %v1468_v55, inf }
  0xd7   : > { %v1544_v35 = vpop.xlane.xlu0 %215  ;;  %1000 = vrsqrt.f32 %v1542_v0  ;;  %v308_v44 = vmul.f32 %v991_v60, %v1433_v41  ;;  %vm2399_vm11 = vcmp.lt.s32.totalorder %v1347_v10, %v1337_v7  ;;  %v306_v2 = vsel %vm304_vm15, %v305_v47, %v303_v46 }
  0xd8   : > { %v1590_v8 = vsel %vm2399_vm11, %v292_v45, -1e+10  ;;  %vm332_vm14 = vcmp.eq.f32.partialorder %v1468_v55, 0.0  ;;  %v333_v9 = vand.u32 2147483648, %v1468_v55  ;;  %1002 = vrsqrt.f32 %v1544_v35 }
  0xd9   : > { %v993_v52 = vpop.eup %992  ;;  %vm2400_vm4 = vcmp.lt.s32.totalorder %v1355_v13, %v1337_v7  ;;  %v299_v51 = vsel %vm297_vm2, %v298_v58, %v296_v5  ;;  %vm520_vm10 = vcmp.lt.s32.totalorder %v1371_v18, %v1337_v7  ;;  %vm323_vm13 = vcmp.eq.f32.partialorder %v1470_v56, inf }
  0xda   : > { %v1583_v31 = vpop.xlane.xlu1 %221  ;;  %v995_v1 = vpop.eup %994  ;;  %v1600_v48 = vsel %vm2400_vm4, %v285_v4, -1e+10  ;;  %vm325_vm15 = vcmp.eq.f32.partialorder %v1470_v56, 0.0  ;;  %v317_v22 = vsel %vm316_vm6, %v1431_v40, %v315_v11  ;;  %v310_v13 = vsel %vm309_vm3, %v1433_v41, %v308_v44 }
  0xdb   : > { %v1585_v57 = vpop.xlane.xlu0 %219  ;;  %v329_v47 = vmul.f32 %v993_v52, %v1468_v55  ;;  %vm519_vm2 = vcmp.lt.s32.totalorder %v1375_v19, %v1337_v7  ;;  %1004 = vrsqrt.f32 %v1583_v31  ;;  %v574_v23 = vmax.f32 %v1579_v59, %v1590_v8 }
  0xdc   : > { %v1623_v58 = vsel %vm516_vm1, %v306_v2, -1e+10  ;;  %v322_v60 = vmul.f32 %v995_v1, %v1470_v56  ;;  %v326_v63 = vand.u32 2147483648, %v1470_v56  ;;  %v573_v46 = vmax.f32 %v1536_v62, %v1600_v48 }
  0xdd   : > { %v997_v10 = vpop.eup %996  ;;  %vm522_vm6 = vcmp.lt.s32.totalorder %v1378_v20, %v1337_v7  ;;  %vm344_vm3 = vcmp.eq.f32.partialorder %v1500_v49, inf  ;;  %vm346_vm1 = vcmp.eq.f32.partialorder %v1500_v49, 0.0  ;;  %v347_v14 = vand.u32 2147483648, %v1500_v49 }
  0xde   : > { %v1627_v6 = vpop.xlane.xlu1 %225  ;;  %v999_v45 = vpop.eup %998  ;;  %v1641_v4 = vsel %vm515_vm5, %v299_v51, -1e+10  ;;  %v320_v5 = vsel %vm318_vm0, %v319_v3, %v317_v22  ;;  %v313_v11 = vsel %vm311_vm9, %v312_v12, %v310_v13  ;;  %v343_v44 = vmul.f32 %v997_v10, %v1500_v49 }
  0xdf   : > { %v1629_v53 = vpop.xlane.xlu0 %223  ;;  %v576_v52 = vmax.f32 %v1574_v54, %v1623_v58  ;;  %v331_v1 = vsel %vm330_vm12, %v1468_v55, %v329_v47  ;;  %vm521_vm11 = vcmp.lt.s32.totalorder %v1381_v21, %v1337_v7  ;;  %vm337_vm5 = vcmp.eq.f32.partialorder %v1502_v50, inf }
  0xe0   : > { %1006 = vrsqrt.f32 %v1585_v57  ;;  %v324_v40 = vsel %vm323_vm13, %v1470_v56, %v322_v60  ;;  %v336_v41 = vmul.f32 %v999_v45, %v1502_v50  ;;  %vm339_vm0 = vcmp.eq.f32.partialorder %v1502_v50, 0.0 }
  0xe1   : > { %v1001_v15 = vpop.eup %1000  ;;  %1008 = vrsqrt.f32 %v1627_v6  ;;  %v575_v2 = vmax.f32 %v1531_v61, %v1641_v4  ;;  %v1672_v51 = vsel %vm518_vm8, %v320_v5, -1e+10  ;;  %v1677_v10 = vsel %vm517_vm7, %v313_v11, -1e+10 }
  0xe2   : > { %v1663_v3 = vpop.xlane.xlu1 %229  ;;  %v340_v22 = vand.u32 2147483648, %v1502_v50  ;;  %vm524_vm9 = vcmp.lt.s32.totalorder %v1388_v24, %v1337_v7  ;;  %v334_v13 = vsel %vm332_vm14, %v333_v9, %v331_v1  ;;  %v345_v47 = vsel %vm344_vm3, %v1500_v49, %v343_v44  ;;  %v1003_v60 = vpop.eup %1002 }
  0xe3   : > { %v1665_v12 = vpop.xlane.xlu0 %227  ;;  %v357_v16 = vmul.f32 %v1001_v15, %v1542_v0  ;;  %vm358_vm8 = vcmp.eq.f32.partialorder %v1542_v0, inf  ;;  %v327_v17 = vsel %vm325_vm15, %v326_v63, %v324_v40  ;;  %vm360_vm7 = vcmp.eq.f32.partialorder %v1542_v0, 0.0 }
  0xe4   : > { %v361_v45 = vand.u32 2147483648, %v1542_v0  ;;  %1010 = vrsqrt.f32 %v1629_v53  ;;  %v1695_v55 = vmax.f32 %v574_v23, %v1672_v51  ;;  %v1698_v9 = vmax.f32 %v573_v46, %v1677_v10 }
  0xe5   : > { %v338_v5 = vsel %vm337_vm5, %v1502_v50, %v336_v41  ;;  %1012 = vrsqrt.f32 %v1663_v3  ;;  %v1005_v11 = vpop.eup %1004  ;;  %v1711_v44 = vsel %vm520_vm10, %v334_v13, -1e+10  ;;  %v348_v23 = vsel %vm346_vm1, %v347_v14, %v345_v47 }
  0xe6   : > { %v1704_v56 = vpop.xlane.xlu1 %233  ;;  %vm523_vm12 = vcmp.lt.s32.totalorder %v1391_v25, %v1337_v7  ;;  %vm351_vm14 = vcmp.eq.f32.partialorder %v1544_v35, inf  ;;  %1014 = vrsqrt.f32 %v1665_v12  ;;  %v1722_v46 = vsel %vm519_vm2, %v327_v17, -1e+10 }
  0xe7   : > { %v1706_v63 = vpop.xlane.xlu0 %231  ;;  %v359_v18 = vsel %vm358_vm8, %v1542_v0, %v357_v16  ;;  %v350_v1 = vmul.f32 %v1003_v60, %v1544_v35  ;;  %vm353_vm4 = vcmp.eq.f32.partialorder %v1544_v35, 0.0  ;;  %v341_v49 = vsel %vm339_vm0, %v340_v22, %v338_v5 }
  0xe8   : > { %v354_v14 = vand.u32 2147483648, %v1544_v35  ;;  %vm526_vm10 = vcmp.lt.s32.totalorder %v1394_v26, %v1337_v7  ;;  %vm372_vm13 = vcmp.eq.f32.partialorder %v1583_v31, inf  ;;  %1016 = vrsqrt.f32 %v1704_v56 }
  0xe9   : > { %v1737_v19 = vmax.f32 %v576_v52, %v1711_v44  ;;  %v1742_v15 = vsel %vm522_vm6, %v348_v23, -1e+10  ;;  %v371_v50 = vmul.f32 %v1005_v11, %v1583_v31  ;;  %vm374_vm15 = vcmp.eq.f32.partialorder %v1583_v31, 0.0 }
  0xea   : > { %v1746_v40 = vpop.xlane.xlu1 %237  ;;  %v1007_v22 = vpop.eup %1006  ;;  %v1751_v13 = vmax.f32 %v575_v2, %v1722_v46  ;;  %v362_v52 = vsel %vm360_vm7, %v361_v45, %v359_v18  ;;  %v375_v47 = vand.u32 2147483648, %v1583_v31  ;;  %vm365_vm2 = vcmp.eq.f32.partialorder %v1585_v57, inf }
  0xeb   : > { %v1748_v41 = vpop.xlane.xlu0 %235  ;;  %v1009_v20 = vpop.eup %1008  ;;  %v1760_v16 = vsel %vm521_vm11, %v341_v49, -1e+10  ;;  %v352_v60 = vsel %vm351_vm14, %v1544_v35, %v350_v1  ;;  %vm367_vm6 = vcmp.eq.f32.partialorder %v1585_v57, 0.0  ;;  %v368_v2 = vand.u32 2147483648, %v1585_v57 }
  0xec   : > { %1018 = vrsqrt.f32 %v1706_v63  ;;  %v582_v0 = vmax.f32 %v1695_v55, %v1742_v15  ;;  %vm525_vm3 = vcmp.lt.s32.totalorder %v1397_v27, %v1337_v7  ;;  %vm386_vm1 = vcmp.eq.f32.partialorder %v1627_v6, inf }
  0xed   : > { %vm388_vm11 = vcmp.eq.f32.partialorder %v1627_v6, 0.0  ;;  %v389_v21 = vand.u32 2147483648, %v1627_v6  ;;  %v1778_v17 = vsel %vm524_vm9, %v362_v52, -1e+10  ;;  %v373_v45 = vsel %vm372_vm13, %v1583_v31, %v371_v50 }
  0xee   : > { %2401 = vst [vmem:[#allocation10_spill] sm:$0xff] %v1778_v17  ;;  %v364_v55 = vmul.f32 %v1007_v22, %v1585_v57  ;;  %vm528_vm5 = vcmp.lt.s32.totalorder %v1401_v28, %v1337_v7  ;;  %1020 = vrsqrt.f32 %v1746_v40  ;;  %v1787_v5 = vpop.xlane.xlu1 %241  ;;  %v1011_v11 = vpop.eup %1010  ;;  %v355_v24 = vsel %vm353_vm4, %v354_v14, %v352_v60 }
  0xef   : > { %v385_v18 = vmul.f32 %v1009_v20, %v1627_v6  ;;  %vm379_vm0 = vcmp.eq.f32.partialorder %v1629_v53, inf  ;;  %v1013_v1 = vpop.eup %1012  ;;  %vm381_vm9 = vcmp.eq.f32.partialorder %v1629_v53, 0.0  ;;  %v382_v49 = vand.u32 2147483648, %v1629_v53  ;;  %v1799_v22 = vpop.xlane.xlu0 %239 }
  0xf0   : > { %vm400_vm8 = vcmp.eq.f32.partialorder %v1663_v3, inf  ;;  %v403_v50 = vand.u32 2147483648, %v1663_v3  ;;  %v1015_v52 = vpop.eup %1014  ;;  %v584_v35 = vmax.f32 %v1737_v19, %v1778_v17  ;;  %v376_v14 = vsel %vm374_vm15, %v375_v47, %v373_v45 }
  0xf1   : > { %vm402_vm14 = vcmp.eq.f32.partialorder %v1663_v3, 0.0  ;;  %vm393_vm4 = vcmp.eq.f32.partialorder %v1665_v12, inf  ;;  %1022 = vrsqrt.f32 %v1748_v41  ;;  %v1813_v20 = vsel %vm523_vm12, %v355_v24, -1e+10 }
  0xf2   : > { %v366_v19 = vsel %vm365_vm2, %v1585_v57, %v364_v55  ;;  %v378_v31 = vmul.f32 %v1011_v11, %v1629_v53  ;;  %vm530_vm13 = vcmp.lt.s32.totalorder %v1407_v30, %v1337_v7  ;;  %vm529_vm15 = vcmp.lt.s32.totalorder %v1411_v32, %v1337_v7  ;;  %v1017_v47 = vpop.eup %1016  ;;  %v1840_v24 = vpop.xlane.xlu1 %245 }
  0xf3   : > { %vm395_vm7 = vcmp.eq.f32.partialorder %v1665_v12, 0.0  ;;  %v387_v25 = vsel %vm386_vm1, %v1627_v6, %v385_v18  ;;  %v399_v60 = vmul.f32 %v1013_v1, %v1663_v3  ;;  %v392_v45 = vmul.f32 %v1015_v52, %v1665_v12 }
  0xf4   : > { %1024 = vrsqrt.f32 %v1787_v5  ;;  %v1833_v55 = vsel %vm526_vm10, %v376_v14, -1e+10  ;;  %v396_v11 = vand.u32 2147483648, %v1665_v12  ;;  %vm532_vm12 = vcmp.lt.s32.totalorder %v1414_v33, %v1337_v7 }
  0xf5   : > { %vm414_vm2 = vcmp.eq.f32.partialorder %v1704_v56, inf  ;;  %vm416_vm1 = vcmp.eq.f32.partialorder %v1704_v56, 0.0  ;;  %v583_v18 = vmax.f32 %v1751_v13, %v1813_v20  ;;  %v369_v1 = vsel %vm367_vm6, %v368_v2, %v366_v19  ;;  %v1855_v13 = vpop.xlane.xlu0 %243 }
  0xf6   : > { %v413_v26 = vmul.f32 %v1017_v47, %v1704_v56  ;;  %v417_v52 = vand.u32 2147483648, %v1704_v56  ;;  %v1019_v14 = vpop.eup %1018  ;;  %v390_v23 = vsel %vm388_vm11, %v389_v21, %v387_v25  ;;  %v380_v17 = vsel %vm379_vm0, %v1629_v53, %v378_v31  ;;  %v1896_v53 = vpop.xlane.xlu1 %249 }
  0xf7   : > { %vm407_vm10 = vcmp.eq.f32.partialorder %v1706_v63, inf  ;;  %1026 = vrsqrt.f32 %v1799_v22  ;;  %v1858_v57 = vmax.f32 %v582_v0, %v1833_v55  ;;  %v401_v2 = vsel %vm400_vm8, %v1663_v3, %v399_v60 }
  0xf8   : > { %v394_v6 = vsel %vm393_vm4, %v1665_v12, %v392_v45  ;;  %vm409_vm6 = vcmp.eq.f32.partialorder %v1706_v63, 0.0  ;;  %v1021_v21 = vpop.eup %1020  ;;  %v1870_v19 = vsel %vm525_vm3, %v369_v1, -1e+10  ;;  %vm531_vm11 = vcmp.lt.s32.totalorder %v1417_v34, %v1337_v7 }
  0xf9   : > { %v410_v0 = vand.u32 2147483648, %v1706_v63  ;;  %vm428_vm0 = vcmp.eq.f32.partialorder %v1746_v40, inf  ;;  %1028 = vrsqrt.f32 %v1840_v24  ;;  %v1880_v31 = vsel %vm528_vm5, %v390_v23, -1e+10  ;;  %v1919_v1 = vpop.xlane.xlu0 %247 }
  0xfa   : > { %v383_v47 = vsel %vm381_vm9, %v382_v49, %v380_v17  ;;  %v415_v27 = vsel %vm414_vm2, %v1704_v56, %v413_v26  ;;  %v406_v25 = vmul.f32 %v1019_v14, %v1706_v63  ;;  %vm534_vm3 = vcmp.lt.s32.totalorder %v1420_v36, %v1337_v7 }
  0xfb   : > { %v404_v60 = vsel %vm402_vm14, %v403_v50, %v401_v2  ;;  %v397_v28 = vsel %vm395_vm7, %v396_v11, %v394_v6  ;;  %v427_v23 = vmul.f32 %v1021_v21, %v1746_v40  ;;  %1030 = vrsqrt.f32 %v1855_v13  ;;  %v1023_v17 = vpop.eup %1022 }
  0xfc   : > { %v2402_v49 = vmax.f32 %v1698_v9, %v1760_v16  ;;  %vm430_vm5 = vcmp.eq.f32.partialorder %v1746_v40, 0.0  ;;  %v431_v3 = vand.u32 2147483648, %v1746_v40  ;;  %vm421_vm9 = vcmp.eq.f32.partialorder %v1748_v41, inf }
  0xfd   : > { %v1908_v12 = vmax.f32 %v584_v35, %v1880_v31  ;;  %vm2403_vm8 = vcmp.lt.s32.totalorder %v1404_v29, %v1337_v7  ;;  %v418_v11 = vsel %vm416_vm1, %v417_v52, %v415_v27  ;;  %vm423_vm7 = vcmp.eq.f32.partialorder %v1748_v41, 0.0 }
  0xfe   : > { %v1902_v45 = vmax.f32 %v2402_v49, %v1870_v19  ;;  %v1913_v50 = vsel %vm2403_vm8, %v383_v47, -1e+10  ;;  %v424_v9 = vand.u32 2147483648, %v1748_v41  ;;  %v1025_v26 = vpop.eup %1024  ;;  %v1924_v35 = vsel %vm530_vm13, %v404_v60, -1e+10  ;;  %v2404_v60 = vld [vmem:[#allocation8_spill] sm:$0xff] }
  0xff   : > { %v1929_v29 = vsel %vm529_vm15, %v397_v28, -1e+10  ;;  %v408_v56 = vsel %vm407_vm10, %v1706_v63, %v406_v25  ;;  %vm533_vm14 = vcmp.lt.s32.totalorder %v1423_v37, %v1337_v7  ;;  %vm536_vm4 = vcmp.lt.s32.totalorder %v1426_v38, %v1337_v7 }
 0x100   : > { %1032 = vrsqrt.f32 %v1896_v53  ;;  %v429_v30 = vsel %vm428_vm0, %v1746_v40, %v427_v23  ;;  %v420_v32 = vmul.f32 %v1023_v17, %v1748_v41  ;;  %v441_v52 = vmul.f32 %v1025_v26, %v1787_v5 }
 0x101   : > { %vm442_vm13 = vcmp.eq.f32.partialorder %v1787_v5, inf  ;;  %vm535_vm15 = vcmp.lt.s32.totalorder %v1429_v39, %v1337_v7  ;;  %v1948_v14 = vmax.f32 %v583_v18, %v1913_v50  ;;  %v1953_v2 = vsel %vm532_vm12, %v418_v11, -1e+10  ;;  %v1027_v6 = vpop.eup %1026 }
 0x102   : > { %vm444_vm2 = vcmp.eq.f32.partialorder %v1787_v5, 0.0  ;;  %vm538_vm1 = vcmp.lt.s32.totalorder %v1436_v42, %v1337_v7  ;;  %vm537_vm10 = vcmp.lt.s32.totalorder %v1439_v43, %v1337_v7  ;;  %1034 = vrsqrt.f32 %v1919_v1 }
 0x103   : > { %v590_v18 = vmax.f32 %v1858_v57, %v1924_v35  ;;  %v589_v21 = vmax.f32 %v1902_v45, %v1929_v29  ;;  %v411_v33 = vsel %vm409_vm6, %v410_v0, %v408_v56  ;;  %v445_v47 = vand.u32 2147483648, %v1787_v5  ;;  %v1029_v57 = vpop.eup %1028  ;;  %v2405_v45 = vld [vmem:[#allocation9_spill] sm:$0xff] }
 0x104   : > { %v432_v27 = vsel %vm430_vm5, %v431_v3, %v429_v30  ;;  %v434_v25 = vmul.f32 %v1027_v6, %v1799_v22  ;;  %vm435_vm12 = vcmp.eq.f32.partialorder %v1799_v22, inf  ;;  %vm437_vm0 = vcmp.eq.f32.partialorder %v1799_v22, 0.0 }
 0x105   : > { %vm540_vm8 = vcmp.lt.s32.totalorder %v2404_v60, %v1337_v7  ;;  %v592_v28 = vmax.f32 %v1908_v12, %v1953_v2  ;;  %v422_v63 = vsel %vm421_vm9, %v1748_v41, %v420_v32  ;;  %v443_v40 = vsel %vm442_vm13, %v1787_v5, %v441_v52  ;;  %v1031_v3 = vpop.eup %1030 }
 0x106   : > { %v438_v0 = vand.u32 2147483648, %v1799_v22  ;;  %v1987_v23 = vsel %vm531_vm11, %v411_v33, -1e+10  ;;  %v436_v17 = vsel %vm435_vm12, %v1799_v22, %v434_v25  ;;  %v455_v49 = vmul.f32 %v1029_v57, %v1840_v24 }
 0x107   : > { %vm456_vm6 = vcmp.eq.f32.partialorder %v1840_v24, inf  ;;  %vm539_vm5 = vcmp.lt.s32.totalorder %v2405_v45, %v1337_v7  ;;  %v1997_v12 = vsel %vm534_vm3, %v432_v27, -1e+10  ;;  %vm458_vm9 = vcmp.eq.f32.partialorder %v1840_v24, 0.0 }
 0x108   : > { %v459_v34 = vand.u32 2147483648, %v1840_v24  ;;  %vm449_vm11 = vcmp.eq.f32.partialorder %v1855_v13, inf  ;;  %v425_v11 = vsel %vm423_vm7, %v424_v9, %v422_v63  ;;  %v446_v26 = vsel %vm444_vm2, %v445_v47, %v443_v40 }
 0x109   : > { %v457_v56 = vsel %vm456_vm6, %v1840_v24, %v455_v49  ;;  %v448_v30 = vmul.f32 %v1031_v3, %v1855_v13  ;;  %v591_v36 = vmax.f32 %v1948_v14, %v1987_v23  ;;  %v439_v32 = vsel %vm437_vm0, %v438_v0, %v436_v17 }
 0x10a   : > { %vm451_vm3 = vcmp.eq.f32.partialorder %v1855_v13, 0.0  ;;  %v452_v52 = vand.u32 2147483648, %v1855_v13  ;;  %v1033_v6 = vpop.eup %1032  ;;  %v594_v41 = vmax.f32 %v590_v18, %v1997_v12  ;;  %v460_v9 = vsel %vm458_vm9, %v459_v34, %v457_v56 }
 0x10b   : > { %v450_v5 = vsel %vm449_vm11, %v1855_v13, %v448_v30  ;;  %vm470_vm7 = vcmp.eq.f32.partialorder %v1896_v53, inf  ;;  %v2020_v24 = vsel %vm533_vm14, %v425_v11, -1e+10  ;;  %v2025_v22 = vsel %vm536_vm4, %v446_v26, -1e+10 }
 0x10c   : > { %v453_v14 = vsel %vm451_vm3, %v452_v52, %v450_v5  ;;  %v469_v33 = vmul.f32 %v1033_v6, %v1896_v53  ;;  %v1035_v47 = vpop.eup %1034  ;;  %v2031_v13 = vsel %vm535_vm15, %v439_v32, -1e+10  ;;  %vm472_vm13 = vcmp.eq.f32.partialorder %v1896_v53, 0.0 }
 0x10d   : > { %v473_v37 = vand.u32 2147483648, %v1896_v53  ;;  %vm463_vm14 = vcmp.eq.f32.partialorder %v1919_v1, inf  ;;  %v2039_v38 = vsel %vm538_vm1, %v460_v9, -1e+10  ;;  %v2044_v18 = vsel %vm537_vm10, %v453_v14, -1e+10 }
 0x10e   : > { %v471_v39 = vsel %vm470_vm7, %v1896_v53, %v469_v33  ;;  %v462_v27 = vmul.f32 %v1035_v47, %v1919_v1  ;;  %v593_v25 = vmax.f32 %v589_v21, %v2020_v24  ;;  %v596_v57 = vmax.f32 %v592_v28, %v2025_v22 }
 0x10f   : > { %v474_v63 = vsel %vm472_vm13, %v473_v37, %v471_v39  ;;  %v466_v40 = vand.u32 2147483648, %v1919_v1  ;;  %v595_v43 = vmax.f32 %v591_v36, %v2031_v13  ;;  %vm465_vm4 = vcmp.eq.f32.partialorder %v1919_v1, 0.0 }
 0x110   : > { %v2054_v42 = vsel %vm540_vm8, %v474_v63, -1e+10  ;;  %v464_v0 = vsel %vm463_vm14, %v1919_v1, %v462_v27  ;;  %v598_v53 = vmax.f32 %v594_v41, %v2039_v38  ;;  %v597_v21 = vmax.f32 %v593_v25, %v2044_v18 }
 0x111   : > { %v600_v28 = vmax.f32 %v596_v57, %v2054_v42  ;;  %v467_v17 = vsel %vm465_vm4, %v466_v40, %v464_v0 }
 0x112   : > { %v2065_v49 = vsel %vm539_vm5, %v467_v17, -1e+10  ;;  %v601_v3 = vmax.f32 %v597_v21, %v598_v53 }
 0x113   : > { %v599_v60 = vmax.f32 %v595_v43, %v2065_v49 }
 0x115   : > { %v602_v34 = vmax.f32 %v599_v60, %v600_v28 }
 0x117   : > { %v603_v11 = vmax.f32 %v601_v3, %v602_v34 }
 0x119   : > { %v604_v26 = vrot.slane %v603_v11, 4 }
 0x11b   : > { %v605_v56 = vmax.f32 %v603_v11, %v604_v26  ;;  %v2406_v26 = vld [vmem:[#allocation10_spill] sm:$0xff] }
 0x11d   : > { %v606_v1 = vrot.slane %v605_v56, 2 }
 0x11f   : > { %v607_v30 = vmax.f32 %v605_v56, %v606_v1 }
 0x121   : > { %v608_v36 = vrot.slane %v607_v30, 1 }
 0x123   : > { %v2068_v32 = vmax.f32 %v607_v30, %v608_v36 }
 0x125   : > { %v610_v52 = vsub.f32 %v1536_v62, %v2068_v32  ;;  %v611_v7 = vsub.f32 %v1579_v59, %v2068_v32  ;;  %v612_v45 = vsub.f32 %v1531_v61, %v2068_v32  ;;  %v613_v6 = vsub.f32 %v1574_v54, %v2068_v32 }
 0x126   : > { %v614_v5 = vsub.f32 %v1600_v48, %v2068_v32  ;;  %v615_v33 = vsub.f32 %v1590_v8, %v2068_v32  ;;  %v616_v59 = vsub.f32 %v1641_v4, %v2068_v32  ;;  %v617_v54 = vsub.f32 %v1623_v58, %v2068_v32 }
 0x127   : > { %v642_v41 = vmul.f32 1.442695, %v610_v52  ;;  %v644_v9 = vmul.f32 1.442695, %v611_v7  ;;  %v646_v14 = vmul.f32 1.442695, %v612_v45  ;;  %v618_v48 = vsub.f32 %v1677_v10, %v2068_v32 }
 0x128   : > { %v648_v62 = vmul.f32 1.442695, %v613_v6  ;;  %v650_v61 = vmul.f32 1.442695, %v614_v5  ;;  %v652_v47 = vmul.f32 1.442695, %v615_v33  ;;  %v619_v8 = vsub.f32 %v1672_v51, %v2068_v32 }
 0x129   : > { %1036 = vpow2.f32 %v642_v41  ;;  %v654_v37 = vmul.f32 1.442695, %v616_v59  ;;  %v656_v39 = vmul.f32 1.442695, %v617_v54  ;;  %v620_v25 = vsub.f32 %v1722_v46, %v2068_v32 }
 0x12a   : > { %1038 = vpow2.f32 %v644_v9  ;;  %v658_v58 = vmul.f32 1.442695, %v618_v48  ;;  %v621_v63 = vsub.f32 %v1711_v44, %v2068_v32  ;;  %v660_v51 = vmul.f32 1.442695, %v619_v8 }
 0x12b   : > { %1040 = vpow2.f32 %v646_v14  ;;  %v622_v0 = vsub.f32 %v1760_v16, %v2068_v32  ;;  %v662_v46 = vmul.f32 1.442695, %v620_v25  ;;  %v623_v28 = vsub.f32 %v1742_v15, %v2068_v32 }
 0x12c   : > { %1042 = vpow2.f32 %v648_v62  ;;  %v664_v44 = vmul.f32 1.442695, %v621_v63  ;;  %v624_v3 = vsub.f32 %v1813_v20, %v2068_v32  ;;  %v625_v56 = vsub.f32 %v2406_v26, %v2068_v32 }
 0x12d   : > { %1044 = vpow2.f32 %v650_v61  ;;  %v666_v16 = vmul.f32 1.442695, %v622_v0  ;;  %v668_v15 = vmul.f32 1.442695, %v623_v28  ;;  %v626_v36 = vsub.f32 %v1870_v19, %v2068_v32 }
 0x12e   : > { %1046 = vpow2.f32 %v652_v47  ;;  %v670_v20 = vmul.f32 1.442695, %v624_v3  ;;  %v627_v45 = vsub.f32 %v1833_v55, %v2068_v32  ;;  %v672_v6 = vmul.f32 1.442695, %v625_v56 }
 0x12f   : > { %1048 = vpow2.f32 %v654_v37  ;;  %v628_v5 = vsub.f32 %v1913_v50, %v2068_v32  ;;  %v674_v19 = vmul.f32 1.442695, %v626_v36  ;;  %v629_v62 = vsub.f32 %v1880_v31, %v2068_v32 }
 0x130   : > { %1050 = vpow2.f32 %v656_v39  ;;  %v676_v55 = vmul.f32 1.442695, %v627_v45  ;;  %v630_v54 = vsub.f32 %v1929_v29, %v2068_v32  ;;  %v631_v37 = vsub.f32 %v1924_v35, %v2068_v32 }
 0x131   : > { %1052 = vpow2.f32 %v658_v58  ;;  %v678_v50 = vmul.f32 1.442695, %v628_v5  ;;  %v680_v31 = vmul.f32 1.442695, %v629_v62  ;;  %v632_v25 = vsub.f32 %v1987_v23, %v2068_v32 }
 0x132   : > { %1054 = vpow2.f32 %v660_v51  ;;  %v682_v29 = vmul.f32 1.442695, %v630_v54  ;;  %v633_v63 = vsub.f32 %v1953_v2, %v2068_v32  ;;  %v684_v35 = vmul.f32 1.442695, %v631_v37 }
 0x133   : > { %v2090_v27 = vpop.eup %1036  ;;  %1056 = vpow2.f32 %v662_v46  ;;  %v634_v0 = vsub.f32 %v2020_v24, %v2068_v32  ;;  %v686_v23 = vmul.f32 1.442695, %v632_v25  ;;  %v635_v28 = vsub.f32 %v1997_v12, %v2068_v32 }
 0x134   : > { %v2092_v4 = vpop.eup %1038  ;;  %1058 = vpow2.f32 %v664_v44  ;;  %v688_v2 = vmul.f32 1.442695, %v633_v63  ;;  %v636_v3 = vsub.f32 %v2031_v13, %v2068_v32  ;;  %v637_v26 = vsub.f32 %v2025_v22, %v2068_v32 }
 0x135   : > { %v706_v57 = vadd.f32 %v2092_v4, %v2090_v27  ;;  %v2098_v10 = vpop.eup %1040  ;;  %1060 = vpow2.f32 %v666_v16  ;;  %v690_v24 = vmul.f32 1.442695, %v634_v0  ;;  %v692_v12 = vmul.f32 1.442695, %v635_v28 }
 0x136   : > { %v2103_v43 = vpop.eup %1042  ;;  %1062 = vpow2.f32 %v668_v15  ;;  %v694_v13 = vmul.f32 1.442695, %v636_v3  ;;  %v696_v22 = vmul.f32 1.442695, %v637_v26 }
 0x137   : > { %v707_v40 = vadd.f32 %v2098_v10, %v706_v57  ;;  %v2108_v21 = vpop.eup %1044  ;;  %1064 = vpow2.f32 %v670_v20 }
 0x138   : > { %v2113_v60 = vpop.eup %1046  ;;  %1066 = vpow2.f32 %v672_v6 }
 0x139   : > { %v708_v53 = vadd.f32 %v2103_v43, %v707_v40  ;;  %v2118_v11 = vpop.eup %1048  ;;  %1068 = vpow2.f32 %v674_v19 }
 0x13a   : > { %v2123_v30 = vpop.eup %1050  ;;  %1070 = vpow2.f32 %v676_v55 }
 0x13b   : > { %v709_v17 = vadd.f32 %v2108_v21, %v708_v53  ;;  %v2128_v7 = vpop.eup %1052  ;;  %1072 = vpow2.f32 %v678_v50 }
 0x13c   : > { %v2133_v9 = vpop.eup %1054  ;;  %1074 = vpow2.f32 %v680_v31 }
 0x13d   : > { %v710_v34 = vadd.f32 %v2113_v60, %v709_v17  ;;  %v2138_v33 = vpop.eup %1056  ;;  %1076 = vpow2.f32 %v682_v29 }
 0x13e   : > { %v2143_v61 = vpop.eup %1058  ;;  %1078 = vpow2.f32 %v684_v35 }
 0x13f   : > { %v711_v1 = vadd.f32 %v2118_v11, %v710_v34  ;;  %v2148_v48 = vpop.eup %1060  ;;  %1080 = vpow2.f32 %v686_v23 }
 0x140   : > { %v2153_v39 = vpop.eup %1062  ;;  %1082 = vpow2.f32 %v688_v2 }
 0x141   : > { %v712_v52 = vadd.f32 %v2123_v30, %v711_v1  ;;  %v2158_v57 = vpop.eup %1064  ;;  %v638_v1 = vsub.f32 %v2044_v18, %v2068_v32  ;;  %1084 = vpow2.f32 %v690_v24 }
 0x142   : > { %v2163_v40 = vpop.eup %1066  ;;  %1086 = vpow2.f32 %v692_v12 }
 0x143   : > { %v713_v41 = vadd.f32 %v2128_v7, %v712_v52  ;;  %v2168_v53 = vpop.eup %1068  ;;  %v639_v52 = vsub.f32 %v2039_v38, %v2068_v32  ;;  %1088 = vpow2.f32 %v694_v13  ;;  %v698_v18 = vmul.f32 1.442695, %v638_v1 }
 0x144   : > { %v2173_v17 = vpop.eup %1070  ;;  %1090 = vpow2.f32 %v696_v22 }
 0x145   : > { %v714_v14 = vadd.f32 %v2133_v9, %v713_v41  ;;  %v2178_v34 = vpop.eup %1072  ;;  %v640_v41 = vsub.f32 %v2065_v49, %v2068_v32  ;;  %v700_v38 = vmul.f32 1.442695, %v639_v52  ;;  %1092 = vpow2.f32 %v698_v18 }
 0x146   : > { %v2183_v15 = vpop.eup %1074 }
 0x147   : > { %v715_v59 = vadd.f32 %v2138_v33, %v714_v14  ;;  %v2188_v20 = vpop.eup %1076  ;;  %v641_v14 = vsub.f32 %v2054_v42, %v2068_v32  ;;  %1094 = vpow2.f32 %v700_v38 }
 0x148   : > { %v2193_v6 = vpop.eup %1078 }
 0x149   : > { %v716_v47 = vadd.f32 %v2143_v61, %v715_v59  ;;  %v2198_v19 = vpop.eup %1080  ;;  %v702_v59 = vmul.f32 1.442695, %v640_v41  ;;  %v704_v49 = vmul.f32 1.442695, %v641_v14  ;;  %v1102_v41 = vld [vmem:[%s1287_s29 + $0xf0] sm:$0xff] }
 0x14a   : > { %v1083_v55 = vpop.eup %1082 }
 0x14b   : > { %v717_v8 = vadd.f32 %v2148_v48, %v716_v47  ;;  %v1085_v50 = vpop.eup %1084  ;;  %1096 = vpow2.f32 %v702_v59  ;;  %v1105_v59 = vld [vmem:[%s1287_s29 + $0x10] sm:$0xff] }
 0x14c   : > { %v1087_v37 = vpop.eup %1086  ;;  %1098 = vpow2.f32 %v704_v49 }
 0x14d   : > { %v718_v58 = vadd.f32 %v2153_v39, %v717_v8  ;;  %v1089_v8 = vpop.eup %1088 }
 0x14e   : > { %v1091_v29 = vpop.eup %1090 }
 0x14f   : > { %v719_v51 = vadd.f32 %v2158_v57, %v718_v58  ;;  %v1093_v32 = vpop.eup %1092 }
 0x151   : > { %v720_v46 = vadd.f32 %v2163_v40, %v719_v51  ;;  %v1095_v63 = vpop.eup %1094 }
 0x153   : > { %v721_v44 = vadd.f32 %v2168_v53, %v720_v46 }
 0x155   : > { %v722_v16 = vadd.f32 %v2173_v17, %v721_v44  ;;  %v1097_v51 = vpop.eup %1096 }
 0x156   : > { %v1099_v23 = vpop.eup %1098 }
 0x157   : > { %v723_v56 = vadd.f32 %v2178_v34, %v722_v16 }
 0x159   : > { %v724_v36 = vadd.f32 %v2183_v15, %v723_v56 }
 0x15b   : > { %v725_v45 = vadd.f32 %v2188_v20, %v724_v36 }
 0x15d   : > { %v726_v5 = vadd.f32 %v2193_v6, %v725_v45 }
 0x15f   : > { %v727_v62 = vadd.f32 %v2198_v19, %v726_v5 }
 0x161   : > { %v728_v54 = vadd.f32 %v1083_v55, %v727_v62  ;;  %v1104_v62 = vld [vmem:[%s1287_s29 + $0x8] sm:$0xff] }
 0x163   : > { %v729_v47 = vadd.f32 %v1085_v50, %v728_v54 }
 0x165   : > { %v730_v31 = vadd.f32 %v1087_v37, %v729_v47  ;;  %v1107_v47 = vld [vmem:[%s1287_s29 + $0x20] sm:$0xff] }
 0x167   : > { %v731_v25 = vadd.f32 %v1089_v8, %v730_v31  ;;  %v1108_v31 = vld [vmem:[%s1287_s29 + $0x28] sm:$0xff] }
 0x169   : > { %v732_v42 = vadd.f32 %v1091_v29, %v731_v25  ;;  %v1109_v25 = vld [vmem:[%s1287_s29 + $0x30] sm:$0xff] }
 0x16b   : > { %v733_v58 = vadd.f32 %v1093_v32, %v732_v42  ;;  %v1110_v42 = vld [vmem:[%s1287_s29 + $0x38] sm:$0xff] }
 0x16d   : > { %v734_v35 = vadd.f32 %v1095_v63, %v733_v58  ;;  %v1111_v58 = vld [vmem:[%s1287_s29 + $0x40] sm:$0xff] }
 0x16f   : > { %v735_v0 = vadd.f32 %v1097_v51, %v734_v35  ;;  %v1112_v35 = vld [vmem:[%s1287_s29 + $0x48] sm:$0xff] }
 0x171   : > { %v736_v46 = vadd.f32 %v1099_v23, %v735_v0  ;;  %v1113_v0 = vld [vmem:[%s1287_s29 + $0x50] sm:$0xff] }
 0x173   : > { %v737_v28 = vrot.slane %v736_v46, 4 }
 0x175   : > { %v738_v2 = vadd.f32 %v737_v28, %v736_v46  ;;  %v1114_v46 = vld [vmem:[%s1287_s29 + $0x58] sm:$0xff] }
 0x177   : > { %v739_v44 = vrot.slane %v738_v2, 2 }
 0x179   : > { %v740_v3 = vadd.f32 %v739_v44, %v738_v2  ;;  %v1115_v2 = vld [vmem:[%s1287_s29 + $0x60] sm:$0xff] }
 0x17b   : > { %v741_v24 = vrot.slane %v740_v3, 1 }
 0x17d   : > { %v742_v16 = vadd.f32 %v741_v24, %v740_v3  ;;  %v1116_v3 = vld [vmem:[%s1287_s29 + $0x68] sm:$0xff] }
 0x17f   : > { %1100 = vrcp.f32 %v742_v16  ;;  %v1117_v16 = vld [vmem:[%s1287_s29 + $0x70] sm:$0xff] }
 0x189   : > { %v1101_v26 = vpop.eup %1100 }
 0x18a   : > { %v774_v12 = vmul.f32 %v1101_v26, %v1097_v51  ;;  %v744_v56 = vmul.f32 %v1101_v26, %v2090_v27  ;;  %v745_v1 = vmul.f32 %v1101_v26, %v2092_v4  ;;  %v746_v13 = vmul.f32 %v1101_v26, %v2098_v10 }
 0x18b   : > { %v747_v36 = vmul.f32 %v1101_v26, %v2103_v43  ;;  %v748_v52 = vmul.f32 %v1101_v26, %v2108_v21  ;;  %v749_v22 = vmul.f32 %v1101_v26, %v2113_v60  ;;  %v750_v45 = vmul.f32 %v1101_v26, %v2118_v11 }
 0x18c   : > { %v806_v18 = vmul.f32 %v1102_v41, %v774_v12  ;;  %v751_v5 = vmul.f32 %v1101_v26, %v2123_v30  ;;  %v752_v14 = vmul.f32 %v1101_v26, %v2128_v7  ;;  %v753_v27 = vmul.f32 %v1101_v26, %v2133_v9  ;;  %v1118_v12 = vld [vmem:[%s1287_s29 + $0x78] sm:$0xff] }
 0x18d   : > { %v754_v4 = vmul.f32 %v1101_v26, %v2138_v33  ;;  %v755_v10 = vmul.f32 %v1101_v26, %v2143_v61  ;;  %v756_v43 = vmul.f32 %v1101_v26, %v2148_v48  ;;  %v757_v21 = vmul.f32 %v1101_v26, %v2153_v39  ;;  %v1122_v41 = vld [vmem:[%s1287_s29 + $0x98] sm:$0xff] }
 0x18e   : > { %838 = vst [vmem:[%s2221_s5 + $0xf0] sm:$0xff] %v806_v18  ;;  %v758_v60 = vmul.f32 %v1101_v26, %v2158_v57  ;;  %v759_v11 = vmul.f32 %v1101_v26, %v2163_v40  ;;  %v760_v30 = vmul.f32 %v1101_v26, %v2168_v53  ;;  %v761_v7 = vmul.f32 %v1101_v26, %v2173_v17 }
 0x18f   : > { %v762_v9 = vmul.f32 %v1101_v26, %v2178_v34  ;;  %v2230_v33 = vmul.f32 %v1101_v26, %v2183_v15  ;;  %v2233_v61 = vmul.f32 %v1101_v26, %v2188_v20  ;;  %v2236_v48 = vmul.f32 %v1101_v26, %v2193_v6 }
 0x190   : > { %v2239_v39 = vmul.f32 %v1101_v26, %v2198_v19  ;;  %v2241_v57 = vmul.f32 %v1101_v26, %v1083_v55  ;;  %v2243_v40 = vmul.f32 %v1101_v26, %v1085_v50  ;;  %v2245_v53 = vmul.f32 %v1101_v26, %v1087_v37  ;;  %v1103_v19 = vld [vmem:[%s1287_s29] sm:$0xff]  ;;  %v1106_v50 = vld [vmem:[%s1287_s29 + $0x18] sm:$0xff] }
 0x191   : > { %v2247_v17 = vmul.f32 %v1101_v26, %v1089_v8  ;;  %v2249_v34 = vmul.f32 %v1101_v26, %v1091_v29  ;;  %v2251_v15 = vmul.f32 %v1101_v26, %v1093_v32  ;;  %v2253_v20 = vmul.f32 %v1101_v26, %v1095_v63 }
 0x192   : > { %v2255_v6 = vmul.f32 %v1101_v26, %v1099_v23  ;;  %v776_v38 = vmul.f32 %v1103_v19, %v744_v56  ;;  %v777_v55 = vmul.f32 %v1104_v62, %v745_v1  ;;  %v778_v54 = vmul.f32 %v1105_v59, %v746_v13  ;;  %v1119_v1 = vld [vmem:[%s1287_s29 + $0x80] sm:$0xff]  ;;  %v1133_v19 = vld [vmem:[%s1287_s29 + $0xf8] sm:$0xff] }
 0x193   : > { %v779_v49 = vmul.f32 %v1106_v50, %v747_v36  ;;  %v780_v37 = vmul.f32 %v1107_v47, %v748_v52  ;;  %v781_v8 = vmul.f32 %v1108_v31, %v749_v22  ;;  %v782_v29 = vmul.f32 %v1109_v25, %v750_v45  ;;  %v1120_v36 = vld [vmem:[%s1287_s29 + $0x88] sm:$0xff]  ;;  %v1121_v22 = vld [vmem:[%s1287_s29 + $0x90] sm:$0xff] }
 0x194   : > { %v783_v32 = vmul.f32 %v1110_v42, %v751_v5  ;;  %v784_v63 = vmul.f32 %v1111_v58, %v752_v14  ;;  %v785_v51 = vmul.f32 %v1112_v35, %v753_v27  ;;  %v786_v23 = vmul.f32 %v1113_v0, %v754_v4  ;;  %808 = vst [vmem:[%s2221_s5] sm:$0xff] %v776_v38  ;;  %v1123_v5 = vld [vmem:[%s1287_s29 + $0xa0] sm:$0xff]  ;;  %v1124_v27 = vld [vmem:[%s1287_s29 + $0xa8] sm:$0xff] }
 0x195   : > { %809 = vst [vmem:[%s2221_s5 + $0x8] sm:$0xff] %v777_v55  ;;  %810 = vst [vmem:[%s2221_s5 + $0x10] sm:$0xff] %v778_v54  ;;  %v787_v28 = vmul.f32 %v1114_v46, %v755_v10  ;;  %v788_v44 = vmul.f32 %v1115_v2, %v756_v43  ;;  %v789_v24 = vmul.f32 %v1116_v3, %v757_v21  ;;  %v1125_v10 = vld [vmem:[%s1287_s29 + $0xb0] sm:$0xff]  ;;  %v1126_v21 = vld [vmem:[%s1287_s29 + $0xb8] sm:$0xff] }
 0x196   : > { %v790_v26 = vmul.f32 %v1117_v16, %v758_v60  ;;  %811 = vst [vmem:[%s2221_s5 + $0x18] sm:$0xff] %v779_v49  ;;  %812 = vst [vmem:[%s2221_s5 + $0x20] sm:$0xff] %v780_v37  ;;  %v791_v56 = vmul.f32 %v1118_v12, %v759_v11  ;;  %v792_v13 = vmul.f32 %v1119_v1, %v760_v30  ;;  %v1127_v11 = vld [vmem:[%s1287_s29 + $0xc0] sm:$0xff] }
 0x197   : > { %813 = vst [vmem:[%s2221_s5 + $0x28] sm:$0xff] %v781_v8  ;;  %814 = vst [vmem:[%s2221_s5 + $0x30] sm:$0xff] %v782_v29  ;;  %v793_v52 = vmul.f32 %v1120_v36, %v761_v7  ;;  %v794_v45 = vmul.f32 %v1121_v22, %v762_v9  ;;  %v795_v18 = vmul.f32 %v1122_v41, %v2230_v33  ;;  %v1128_v7 = vld [vmem:[%s1287_s29 + $0xc8] sm:$0xff]  ;;  %v1129_v33 = vld [vmem:[%s1287_s29 + $0xd0] sm:$0xff] }
 0x198   : > { %815 = vst [vmem:[%s2221_s5 + $0x38] sm:$0xff] %v783_v32  ;;  %816 = vst [vmem:[%s2221_s5 + $0x40] sm:$0xff] %v784_v63  ;;  %v796_v14 = vmul.f32 %v1123_v5, %v2233_v61  ;;  %v797_v4 = vmul.f32 %v1124_v27, %v2236_v48  ;;  %v798_v43 = vmul.f32 %v1125_v10, %v2239_v39  ;;  %v1130_v48 = vld [vmem:[%s1287_s29 + $0xd8] sm:$0xff] }
 0x199   : > { %817 = vst [vmem:[%s2221_s5 + $0x48] sm:$0xff] %v785_v51  ;;  %818 = vst [vmem:[%s2221_s5 + $0x50] sm:$0xff] %v786_v23  ;;  %v799_v60 = vmul.f32 %v1126_v21, %v2241_v57  ;;  %v800_v30 = vmul.f32 %v1127_v11, %v2243_v40  ;;  %v801_v9 = vmul.f32 %v1128_v7, %v2245_v53  ;;  %v1131_v57 = vld [vmem:[%s1287_s29 + $0xe0] sm:$0xff]  ;;  %v1132_v53 = vld [vmem:[%s1287_s29 + $0xe8] sm:$0xff] }
 0x19a   : > { %819 = vst [vmem:[%s2221_s5 + $0x58] sm:$0xff] %v787_v28  ;;  %820 = vst [vmem:[%s2221_s5 + $0x60] sm:$0xff] %v788_v44  ;;  %v802_v61 = vmul.f32 %v1129_v33, %v2247_v17  ;;  %v803_v39 = vmul.f32 %v1130_v48, %v2249_v34  ;;  %v804_v40 = vmul.f32 %v1131_v57, %v2251_v15 }
 0x19b   : > { %821 = vst [vmem:[%s2221_s5 + $0x68] sm:$0xff] %v789_v24  ;;  %822 = vst [vmem:[%s2221_s5 + $0x70] sm:$0xff] %v790_v26  ;;  %v805_v17 = vmul.f32 %v1132_v53, %v2253_v20  ;;  %v807_v38 = vmul.f32 %v1133_v19, %v2255_v6 }
 0x19c   : > { %823 = vst [vmem:[%s2221_s5 + $0x78] sm:$0xff] %v791_v56  ;;  %824 = vst [vmem:[%s2221_s5 + $0x80] sm:$0xff] %v792_v13 }
 0x19d   : > { %825 = vst [vmem:[%s2221_s5 + $0x88] sm:$0xff] %v793_v52  ;;  %826 = vst [vmem:[%s2221_s5 + $0x90] sm:$0xff] %v794_v45 }
 0x19e   : > { %827 = vst [vmem:[%s2221_s5 + $0x98] sm:$0xff] %v795_v18  ;;  %828 = vst [vmem:[%s2221_s5 + $0xa0] sm:$0xff] %v796_v14 }
 0x19f   : > { %829 = vst [vmem:[%s2221_s5 + $0xa8] sm:$0xff] %v797_v4  ;;  %830 = vst [vmem:[%s2221_s5 + $0xb0] sm:$0xff] %v798_v43 }
 0x1a0   : > { %831 = vst [vmem:[%s2221_s5 + $0xb8] sm:$0xff] %v799_v60  ;;  %832 = vst [vmem:[%s2221_s5 + $0xc0] sm:$0xff] %v800_v30 }
 0x1a1   : > { %833 = vst [vmem:[%s2221_s5 + $0xc8] sm:$0xff] %v801_v9  ;;  %834 = vst [vmem:[%s2221_s5 + $0xd0] sm:$0xff] %v802_v61 }
 0x1a2   : > { %835 = vst [vmem:[%s2221_s5 + $0xd8] sm:$0xff] %v803_v39  ;;  %836 = vst [vmem:[%s2221_s5 + $0xe0] sm:$0xff] %v804_v40 }
 0x1a3   : > { %837 = vst [vmem:[%s2221_s5 + $0xe8] sm:$0xff] %v805_v17  ;;  %839 = vst [vmem:[%s2221_s5 + $0xf8] sm:$0xff] %v807_v38 }
 0x1a4   : > { %1159 = shalt.err (!%p1156_p8)
}
 0x1a5   : > { %s1160_s20 = scalar_lea.hbm %s2318_s10, 4096  ;;  %s1164_s26 = scalar_lea.hbm %s2389_s2, 8192 }
 0x1a6   : > { %p1161_p9 = scmp.ne.s32.totalorder %s2318_s10, %s1160_s20  ;;  %p1165_p0 = scmp.lt.u32.totalorder %s2318_s10, %s2389_s2 }
 0x1a7   : > { %p1166_p1 = scmp.lt.u32.totalorder %s1164_s26, %s1160_s20  ;;  %p1168_p3 = scmp.lt.u32.totalorder %s1160_s20, %s2318_s10 }
 0x1a8   : > { %p1162_p12 = pnand %p1161_p9, %p1272_p10 }
 0x1a9   : > { %p1167_p2 = por %p1166_p1, %p1165_p0 }
 0x1aa   : > { %p1163_p13 = pneg %p1162_p12 }
 0x1ab   : > { %p1169_p4 = por %p1168_p3, %p1167_p2 }
 0x1ad   : > { %p1170_p5 = pnand %p1169_p4, %p1163_p13 }
 0x1af   : > { %1173 = shalt.err (!%p1170_p5)
}
 0x1b0   : > { %s1214_s29 = smov 128   ;;  %s1215_s30 = smov 8  }
 0x1b1   : > { %930 = dma.vmem_to_hbm [thread:$0]  (%p1272_p10), %s2322_s7, 4096, %s2318_s10, %s2346_s11, %s1214_s29, %s1214_s29, %s1215_s30  }
 0x1b2 PF: > { %p936_p6 = scmp.ge.s32.totalorder %s1210_s16, 2  ;;  %s869_s3 = sand.u32 1, %s1198_s14  }
 0x1b3   : > { %s870_s4 = scalar_lea.sflag [#allocation5], %s869_s3 }
 0x1b4   : > { %p933_p7 = pnand %p936_p6, %p1276_p11 }
 0x1b6   : > { %1193 = dma.done.wait (!%p933_p7), %s870_s4, 4096  }
 0x1b7   : > { %1195 = vsyncadd (!%p933_p7), %s870_s4, 4294963200  ;;  %p18_p8 = scmp.ge.s32.totalorder %s1259_s19, 4   ;;  %s2407_s14 = smov %s1202_s15 }
 0x1b8   : > { %s2408_s15 = smov %s1206_s0  ;;  %s2409_s0 = smov %s1270_s22 }
 0x1b9   : > { %s2410_s16 = smov %s1259_s19  ;;  %20 = sbr.rel (!%p18_p8) target bundleno = 18 (0x12), region = 59 }
 0x1c0   :  { %875 = vsyncpa [#allocation5], 1 }
 0x1c1   :  { %877 = vsyncpa [#allocation5 + $0x1], 1 }

// kernel: prottrans_forward.2
= control target key start
LH: loop header
LB: loop body
LE: loop exit
PB: predicated region body
PF: predicated region fallthrough
CT: control target
= control target key end

     0   :  { %s1559_s1 = inlined_call_operand.vmem [shape: bf16[128,128], index: 1, kind: input, shape index: {}]   ;;  %s1560_s0 = inlined_call_operand.vmem [shape: bf16[512,128], index: 0, kind: input, shape index: {}]   ;;  %s1561_s2 = inlined_call_operand.vmem [shape: f32[512,128], index: 2, kind: output, shape index: {}]  }
   0x1   :  { %v1192_v0 = vld [vmem:[%s1559_s1] sm:$0xff]   ;;  %v1193_v1 = vld [vmem:[%s1559_s1 + $0x8] sm:$0xff]   ;;  %v1194_v2 = vld [vmem:[%s1559_s1 + $0x10] sm:$0xff]  }
   0x2   :  { %1096 = vmatprep.subr.bf16.mxu0 %v1192_v0  ;;  %1176 = vmatprep.subr.bf16.mxu1 %v1192_v0  ;;  %v1195_v3 = vld [vmem:[%s1559_s1 + $0x18] sm:$0xff]   ;;  %v1200_v4 = vld [vmem:[%s1560_s0] sm:$0xff]   ;;  %v1197_v7 = vld [vmem:[%s1559_s1 + $0x28] sm:$0xff]  }
   0x3   :  { %1097 = vmatpush3.bf16.msra.mxu0 %v1192_v0  ;;  %1184 = vmatpush3.bf16.msra.mxu1 %v1192_v0  ;;  %v1201_v5 = vld [vmem:[%s1560_s0 + $0x80] sm:$0xff]   ;;  %v1198_v8 = vld [vmem:[%s1559_s1 + $0x30] sm:$0xff]   ;;  %v1199_v9 = vld [vmem:[%s1559_s1 + $0x38] sm:$0xff]  }
   0x4   :  { %1098 = vmatprep.subr.bf16.mxu0 %v1193_v1  ;;  %1177 = vmatprep.subr.bf16.mxu1 %v1193_v1  ;;  %v1196_v6 = vld [vmem:[%s1559_s1 + $0x20] sm:$0xff]   ;;  %v1202_v10 = vld [vmem:[%s1560_s0 + $0x8] sm:$0xff]   ;;  %v1204_v12 = vld [vmem:[%s1560_s0 + $0x10] sm:$0xff]  }
   0x5   :  { %1112 = vmatprep.mubr.bf16.mxu0 %v1200_v4  ;;  %1144 = vmatprep.mubr.bf16.mxu1 %v1201_v5  ;;  %v1203_v11 = vld [vmem:[%s1560_s0 + $0x88] sm:$0xff]   ;;  %v1205_v13 = vld [vmem:[%s1560_s0 + $0x90] sm:$0xff]   ;;  %v1206_v14 = vld [vmem:[%s1560_s0 + $0x18] sm:$0xff]  }
   0x6   :  { %v1207_v15 = vld [vmem:[%s1560_s0 + $0x98] sm:$0xff]   ;;  %v1208_v16 = vld [vmem:[%s1560_s0 + $0x20] sm:$0xff]   ;;  %v1210_v18 = vld [vmem:[%s1560_s0 + $0x28] sm:$0xff]  }
   0x7   :  { %1099 = vmatpush3.bf16.msra.mxu0 %v1193_v1  ;;  %1185 = vmatpush3.bf16.msra.mxu1 %v1193_v1  ;;  %v1209_v17 = vld [vmem:[%s1560_s0 + $0xa0] sm:$0xff]   ;;  %v1211_v19 = vld [vmem:[%s1560_s0 + $0xa8] sm:$0xff]   ;;  %v1212_v20 = vld [vmem:[%s1560_s0 + $0x30] sm:$0xff]  }
   0x8   :  { %1100 = vmatprep.subr.bf16.mxu0 %v1194_v2  ;;  %1178 = vmatprep.subr.bf16.mxu1 %v1194_v2  ;;  %v1213_v21 = vld [vmem:[%s1560_s0 + $0xb0] sm:$0xff]   ;;  %v1214_v22 = vld [vmem:[%s1560_s0 + $0x38] sm:$0xff]   ;;  %v1216_v24 = vld [vmem:[%s1560_s0 + $0x40] sm:$0xff]  }
   0x9   :  { %v1215_v23 = vld [vmem:[%s1560_s0 + $0xb8] sm:$0xff]   ;;  %v1217_v25 = vld [vmem:[%s1560_s0 + $0xc0] sm:$0xff]   ;;  %v1218_v26 = vld [vmem:[%s1560_s0 + $0x48] sm:$0xff]  }
   0xa   :  { %v1219_v27 = vld [vmem:[%s1560_s0 + $0xc8] sm:$0xff]   ;;  %v1220_v28 = vld [vmem:[%s1560_s0 + $0x50] sm:$0xff]   ;;  %v1222_v30 = vld [vmem:[%s1560_s0 + $0x58] sm:$0xff]  }
   0xb   :  { %1101 = vmatpush3.bf16.msra.mxu0 %v1194_v2  ;;  %1186 = vmatpush3.bf16.msra.mxu1 %v1194_v2  ;;  %v1221_v29 = vld [vmem:[%s1560_s0 + $0xd0] sm:$0xff]   ;;  %v1223_v31 = vld [vmem:[%s1560_s0 + $0xd8] sm:$0xff]   ;;  %v1224_v32 = vld [vmem:[%s1560_s0 + $0x60] sm:$0xff]  }
   0xc   :  { %1102 = vmatprep.subr.bf16.mxu0 %v1195_v3  ;;  %1179 = vmatprep.subr.bf16.mxu1 %v1195_v3  ;;  %v1225_v33 = vld [vmem:[%s1560_s0 + $0xe0] sm:$0xff]   ;;  %v1226_v34 = vld [vmem:[%s1560_s0 + $0x68] sm:$0xff]   ;;  %v1228_v36 = vld [vmem:[%s1560_s0 + $0x70] sm:$0xff]  }
   0xd   :  { %v1227_v35 = vld [vmem:[%s1560_s0 + $0xe8] sm:$0xff]   ;;  %v1229_v37 = vld [vmem:[%s1560_s0 + $0xf0] sm:$0xff]   ;;  %v1230_v38 = vld [vmem:[%s1560_s0 + $0x78] sm:$0xff]  }
   0xe   :  { %v1231_v39 = vld [vmem:[%s1560_s0 + $0xf8] sm:$0xff]  }
   0xf   :  { %1103 = vmatpush3.bf16.msra.mxu0 %v1195_v3  ;;  %1187 = vmatpush3.bf16.msra.mxu1 %v1195_v3 }
  0x10   :  { %1104 = vmatprep.subr.bf16.mxu0 %v1196_v6  ;;  %1180 = vmatprep.subr.bf16.mxu1 %v1196_v6 }
  0x13   :  { %1105 = vmatpush3.bf16.msra.mxu0 %v1196_v6  ;;  %1188 = vmatpush3.bf16.msra.mxu1 %v1196_v6 }
  0x14   :  { %1106 = vmatprep.subr.bf16.mxu0 %v1197_v7  ;;  %1181 = vmatprep.subr.bf16.mxu1 %v1197_v7 }
  0x17   :  { %1107 = vmatpush3.bf16.msra.mxu0 %v1197_v7  ;;  %1189 = vmatpush3.bf16.msra.mxu1 %v1197_v7 }
  0x18   :  { %1108 = vmatprep.subr.bf16.mxu0 %v1198_v8  ;;  %1182 = vmatprep.subr.bf16.mxu1 %v1198_v8 }
  0x1b   :  { %1109 = vmatpush3.bf16.msra.mxu0 %v1198_v8  ;;  %1190 = vmatpush3.bf16.msra.mxu1 %v1198_v8 }
  0x1c   :  { %1110 = vmatprep.subr.bf16.mxu0 %v1199_v9  ;;  %1183 = vmatprep.subr.bf16.mxu1 %v1199_v9 }
  0x1f   :  { %1111 = vmatpush3.bf16.msra.mxu0 %v1199_v9  ;;  %1191 = vmatpush3.bf16.msra.mxu1 %v1199_v9 }
  0x22   :  { %1113 = vmatmul.mubr.bf16.vlgmr.msra.gmra.mrb[0].mxu0 %v1202_v10  ;;  %1145 = vmatmul.mubr.bf16.vlgmr.msra.gmra.mrb[0].mxu1 %v1203_v11 }
  0x23   :  { %1116 = vmatprep.mubr.bf16.mxu0 %v1204_v12  ;;  %1148 = vmatprep.mubr.bf16.mxu1 %v1205_v13 }
  0x2a   :  { %1117 = vmatmul.mubr.bf16.gmra.mrb[4].mxu0 %v1206_v14  ;;  %1149 = vmatmul.mubr.bf16.gmra.mrb[4].mxu1 %v1207_v15 }
  0x2b   :  { %1120 = vmatprep.mubr.bf16.mxu0 %v1208_v16  ;;  %1152 = vmatprep.mubr.bf16.mxu1 %v1209_v17 }
  0x32   :  { %1121 = vmatmul.mubr.bf16.gmra.mrb[8].mxu0 %v1210_v18  ;;  %1153 = vmatmul.mubr.bf16.gmra.mrb[8].mxu1 %v1211_v19 }
  0x33   :  { %1124 = vmatprep.mubr.bf16.mxu0 %v1212_v20  ;;  %1156 = vmatprep.mubr.bf16.mxu1 %v1213_v21 }
  0x3a   :  { %1125 = vmatmul.mubr.bf16.gmra.mrb[12].mxu0 %v1214_v22  ;;  %1157 = vmatmul.mubr.bf16.gmra.mrb[12].mxu1 %v1215_v23 }
  0x3b   :  { %1128 = vmatprep.mubr.bf16.mxu0 %v1216_v24  ;;  %1160 = vmatprep.mubr.bf16.mxu1 %v1217_v25 }
  0x42   :  { %1129 = vmatmul.mubr.bf16.gmra.mrb[16].mxu0 %v1218_v26  ;;  %1161 = vmatmul.mubr.bf16.gmra.mrb[16].mxu1 %v1219_v27 }
  0x43   :  { %1132 = vmatprep.mubr.bf16.mxu0 %v1220_v28  ;;  %1164 = vmatprep.mubr.bf16.mxu1 %v1221_v29 }
  0x4a   :  { %1133 = vmatmul.mubr.bf16.gmra.mrb[20].mxu0 %v1222_v30  ;;  %1165 = vmatmul.mubr.bf16.gmra.mrb[20].mxu1 %v1223_v31 }
  0x4b   :  { %1136 = vmatprep.mubr.bf16.mxu0 %v1224_v32  ;;  %1168 = vmatprep.mubr.bf16.mxu1 %v1225_v33 }
  0x52   :  { %1137 = vmatmul.mubr.bf16.gmra.mrb[24].mxu0 %v1226_v34  ;;  %1169 = vmatmul.mubr.bf16.gmra.mrb[24].mxu1 %v1227_v35 }
  0x53   :  { %1140 = vmatprep.mubr.bf16.mxu0 %v1228_v36  ;;  %1172 = vmatprep.mubr.bf16.mxu1 %v1229_v37 }
  0x5a   :  { %1141 = vmatmul.mubr.bf16.gmra.mrb[28].mxu0 %v1230_v38  ;;  %1173 = vmatmul.mubr.bf16.gmra.mrb[28].mxu1 %v1231_v39 }
  0xf5   :  { %v1114_v40 = vpop.f32.mrb[0].mxu0  ;;  %v1146_v41 = vpop.f32.mrb[0].mxu1 }
  0xf6   :  { %950 = vst [vmem:[%s1561_s2 + $0x10] sm:$0xff] %v1114_v40  ;;  %982 = vst [vmem:[%s1561_s2 + $0x110] sm:$0xff] %v1146_v41  ;;  %v498_v42 = vpop.f32.mrb[1].mxu0  ;;  %v626_v43 = vpop.f32.mrb[1].mxu1 }
  0xf7   :  { %948 = vst [vmem:[%s1561_s2] sm:$0xff] %v498_v42  ;;  %980 = vst [vmem:[%s1561_s2 + $0x100] sm:$0xff] %v626_v43  ;;  %v1115_v44 = vpop.f32.mrb[2].mxu0  ;;  %v1147_v45 = vpop.f32.mrb[2].mxu1 }
  0xf8   :  { %951 = vst [vmem:[%s1561_s2 + $0x18] sm:$0xff] %v1115_v44  ;;  %983 = vst [vmem:[%s1561_s2 + $0x118] sm:$0xff] %v1147_v45  ;;  %v501_v46 = vpop.f32.mrb[3].mxu0  ;;  %v629_v47 = vpop.f32.mrb[3].mxu1 }
  0xf9   :  { %949 = vst [vmem:[%s1561_s2 + $0x8] sm:$0xff] %v501_v46  ;;  %981 = vst [vmem:[%s1561_s2 + $0x108] sm:$0xff] %v629_v47 }
  0xfd   :  { %v1118_v48 = vpop.f32.mrb[4].mxu0  ;;  %v1150_v49 = vpop.f32.mrb[4].mxu1 }
  0xfe   :  { %954 = vst [vmem:[%s1561_s2 + $0x30] sm:$0xff] %v1118_v48  ;;  %986 = vst [vmem:[%s1561_s2 + $0x130] sm:$0xff] %v1150_v49  ;;  %v514_v50 = vpop.f32.mrb[5].mxu0  ;;  %v642_v51 = vpop.f32.mrb[5].mxu1 }
  0xff   :  { %952 = vst [vmem:[%s1561_s2 + $0x20] sm:$0xff] %v514_v50  ;;  %984 = vst [vmem:[%s1561_s2 + $0x120] sm:$0xff] %v642_v51  ;;  %v1119_v52 = vpop.f32.mrb[6].mxu0  ;;  %v1151_v53 = vpop.f32.mrb[6].mxu1 }
 0x100   :  { %955 = vst [vmem:[%s1561_s2 + $0x38] sm:$0xff] %v1119_v52  ;;  %987 = vst [vmem:[%s1561_s2 + $0x138] sm:$0xff] %v1151_v53  ;;  %v517_v54 = vpop.f32.mrb[7].mxu0  ;;  %v645_v55 = vpop.f32.mrb[7].mxu1 }
 0x101   :  { %953 = vst [vmem:[%s1561_s2 + $0x28] sm:$0xff] %v517_v54  ;;  %985 = vst [vmem:[%s1561_s2 + $0x128] sm:$0xff] %v645_v55 }
 0x105   :  { %v1122_v56 = vpop.f32.mrb[8].mxu0  ;;  %v1154_v57 = vpop.f32.mrb[8].mxu1 }
 0x106   :  { %958 = vst [vmem:[%s1561_s2 + $0x50] sm:$0xff] %v1122_v56  ;;  %990 = vst [vmem:[%s1561_s2 + $0x150] sm:$0xff] %v1154_v57  ;;  %v530_v58 = vpop.f32.mrb[9].mxu0  ;;  %v658_v59 = vpop.f32.mrb[9].mxu1 }
 0x107   :  { %956 = vst [vmem:[%s1561_s2 + $0x40] sm:$0xff] %v530_v58  ;;  %988 = vst [vmem:[%s1561_s2 + $0x140] sm:$0xff] %v658_v59  ;;  %v1123_v60 = vpop.f32.mrb[10].mxu0  ;;  %v1155_v61 = vpop.f32.mrb[10].mxu1 }
 0x108   :  { %959 = vst [vmem:[%s1561_s2 + $0x58] sm:$0xff] %v1123_v60  ;;  %991 = vst [vmem:[%s1561_s2 + $0x158] sm:$0xff] %v1155_v61  ;;  %v533_v62 = vpop.f32.mrb[11].mxu0  ;;  %v661_v63 = vpop.f32.mrb[11].mxu1 }
 0x109   :  { %957 = vst [vmem:[%s1561_s2 + $0x48] sm:$0xff] %v533_v62  ;;  %989 = vst [vmem:[%s1561_s2 + $0x148] sm:$0xff] %v661_v63 }
 0x10d   :  { %v1126_v0 = vpop.f32.mrb[12].mxu0  ;;  %v1158_v1 = vpop.f32.mrb[12].mxu1 }
 0x10e   :  { %962 = vst [vmem:[%s1561_s2 + $0x70] sm:$0xff] %v1126_v0  ;;  %994 = vst [vmem:[%s1561_s2 + $0x170] sm:$0xff] %v1158_v1  ;;  %v546_v2 = vpop.f32.mrb[13].mxu0  ;;  %v674_v3 = vpop.f32.mrb[13].mxu1 }
 0x10f   :  { %960 = vst [vmem:[%s1561_s2 + $0x60] sm:$0xff] %v546_v2  ;;  %992 = vst [vmem:[%s1561_s2 + $0x160] sm:$0xff] %v674_v3  ;;  %v1127_v4 = vpop.f32.mrb[14].mxu0  ;;  %v1159_v5 = vpop.f32.mrb[14].mxu1 }
 0x110   :  { %963 = vst [vmem:[%s1561_s2 + $0x78] sm:$0xff] %v1127_v4  ;;  %995 = vst [vmem:[%s1561_s2 + $0x178] sm:$0xff] %v1159_v5  ;;  %v549_v6 = vpop.f32.mrb[15].mxu0  ;;  %v677_v7 = vpop.f32.mrb[15].mxu1 }
 0x111   :  { %961 = vst [vmem:[%s1561_s2 + $0x68] sm:$0xff] %v549_v6  ;;  %993 = vst [vmem:[%s1561_s2 + $0x168] sm:$0xff] %v677_v7 }
 0x115   :  { %v1130_v8 = vpop.f32.mrb[16].mxu0  ;;  %v1162_v9 = vpop.f32.mrb[16].mxu1 }
 0x116   :  { %966 = vst [vmem:[%s1561_s2 + $0x90] sm:$0xff] %v1130_v8  ;;  %998 = vst [vmem:[%s1561_s2 + $0x190] sm:$0xff] %v1162_v9  ;;  %v562_v10 = vpop.f32.mrb[17].mxu0  ;;  %v690_v11 = vpop.f32.mrb[17].mxu1 }
 0x117   :  { %964 = vst [vmem:[%s1561_s2 + $0x80] sm:$0xff] %v562_v10  ;;  %996 = vst [vmem:[%s1561_s2 + $0x180] sm:$0xff] %v690_v11  ;;  %v1131_v12 = vpop.f32.mrb[18].mxu0  ;;  %v1163_v13 = vpop.f32.mrb[18].mxu1 }
 0x118   :  { %967 = vst [vmem:[%s1561_s2 + $0x98] sm:$0xff] %v1131_v12  ;;  %999 = vst [vmem:[%s1561_s2 + $0x198] sm:$0xff] %v1163_v13  ;;  %v565_v14 = vpop.f32.mrb[19].mxu0  ;;  %v693_v15 = vpop.f32.mrb[19].mxu1 }
 0x119   :  { %965 = vst [vmem:[%s1561_s2 + $0x88] sm:$0xff] %v565_v14  ;;  %997 = vst [vmem:[%s1561_s2 + $0x188] sm:$0xff] %v693_v15 }
 0x11d   :  { %v1134_v16 = vpop.f32.mrb[20].mxu0  ;;  %v1166_v17 = vpop.f32.mrb[20].mxu1 }
 0x11e   :  { %970 = vst [vmem:[%s1561_s2 + $0xb0] sm:$0xff] %v1134_v16  ;;  %1002 = vst [vmem:[%s1561_s2 + $0x1b0] sm:$0xff] %v1166_v17  ;;  %v578_v18 = vpop.f32.mrb[21].mxu0  ;;  %v706_v19 = vpop.f32.mrb[21].mxu1 }
 0x11f   :  { %968 = vst [vmem:[%s1561_s2 + $0xa0] sm:$0xff] %v578_v18  ;;  %1000 = vst [vmem:[%s1561_s2 + $0x1a0] sm:$0xff] %v706_v19  ;;  %v1135_v20 = vpop.f32.mrb[22].mxu0  ;;  %v1167_v21 = vpop.f32.mrb[22].mxu1 }
 0x120   :  { %971 = vst [vmem:[%s1561_s2 + $0xb8] sm:$0xff] %v1135_v20  ;;  %1003 = vst [vmem:[%s1561_s2 + $0x1b8] sm:$0xff] %v1167_v21  ;;  %v581_v22 = vpop.f32.mrb[23].mxu0  ;;  %v709_v23 = vpop.f32.mrb[23].mxu1 }
 0x121   :  { %969 = vst [vmem:[%s1561_s2 + $0xa8] sm:$0xff] %v581_v22  ;;  %1001 = vst [vmem:[%s1561_s2 + $0x1a8] sm:$0xff] %v709_v23 }
 0x125   :  { %v1138_v24 = vpop.f32.mrb[24].mxu0  ;;  %v1170_v25 = vpop.f32.mrb[24].mxu1 }
 0x126   :  { %974 = vst [vmem:[%s1561_s2 + $0xd0] sm:$0xff] %v1138_v24  ;;  %1006 = vst [vmem:[%s1561_s2 + $0x1d0] sm:$0xff] %v1170_v25  ;;  %v594_v26 = vpop.f32.mrb[25].mxu0  ;;  %v722_v27 = vpop.f32.mrb[25].mxu1 }
 0x127   :  { %972 = vst [vmem:[%s1561_s2 + $0xc0] sm:$0xff] %v594_v26  ;;  %1004 = vst [vmem:[%s1561_s2 + $0x1c0] sm:$0xff] %v722_v27  ;;  %v1139_v28 = vpop.f32.mrb[26].mxu0  ;;  %v1171_v29 = vpop.f32.mrb[26].mxu1 }
 0x128   :  { %975 = vst [vmem:[%s1561_s2 + $0xd8] sm:$0xff] %v1139_v28  ;;  %1007 = vst [vmem:[%s1561_s2 + $0x1d8] sm:$0xff] %v1171_v29  ;;  %v597_v30 = vpop.f32.mrb[27].mxu0  ;;  %v725_v31 = vpop.f32.mrb[27].mxu1 }
 0x129   :  { %973 = vst [vmem:[%s1561_s2 + $0xc8] sm:$0xff] %v597_v30  ;;  %1005 = vst [vmem:[%s1561_s2 + $0x1c8] sm:$0xff] %v725_v31 }
 0x12d   :  { %v1142_v32 = vpop.f32.mrb[28].mxu0  ;;  %v1174_v33 = vpop.f32.mrb[28].mxu1 }
 0x12e   :  { %978 = vst [vmem:[%s1561_s2 + $0xf0] sm:$0xff] %v1142_v32  ;;  %1010 = vst [vmem:[%s1561_s2 + $0x1f0] sm:$0xff] %v1174_v33  ;;  %v610_v34 = vpop.f32.mrb[29].mxu0  ;;  %v738_v35 = vpop.f32.mrb[29].mxu1 }
 0x12f   :  { %976 = vst [vmem:[%s1561_s2 + $0xe0] sm:$0xff] %v610_v34  ;;  %1008 = vst [vmem:[%s1561_s2 + $0x1e0] sm:$0xff] %v738_v35  ;;  %v1143_v36 = vpop.f32.mrb[30].mxu0  ;;  %v1175_v37 = vpop.f32.mrb[30].mxu1 }
 0x130   :  { %979 = vst [vmem:[%s1561_s2 + $0xf8] sm:$0xff] %v1143_v36  ;;  %1011 = vst [vmem:[%s1561_s2 + $0x1f8] sm:$0xff] %v1175_v37  ;;  %v613_v38 = vpop.f32.mrb[31].mxu0  ;;  %v741_v39 = vpop.f32.mrb[31].mxu1 }
 0x131   :  { %977 = vst [vmem:[%s1561_s2 + $0xe8] sm:$0xff] %v613_v38  ;;  %1009 = vst [vmem:[%s1561_s2 + $0x1e8] sm:$0xff] %v741_v39 }

</bundles_post_ra>
